<compile_context>
chip_gen: v7x
topology: tpu7x:2x2x1
jax: 0.10.0
libtpu: 0.0.40
codegen_flags: <defaults>
</compile_context>

<pallas_src>
import jax
import jax.numpy as jnp
from jax.experimental import pallas as pl
from jax.experimental.pallas import tpu as pltpu


def context_kernel(xp_ref, w1_ref, w2_ref, bn_ref, o_ref, ypad_ref):
    # xp_ref:   (1, H+2, (W+2)*C)  f32   pre-padded, lane-dense input
    # w*_ref:   (3, (W+2)*C, W*C)  bf16  block-banded conv weights (one per ky tap)
    # bn_ref:   (4, W*C)           f32   folded BN scale/shift, tiled over W
    # o_ref:    (1, H, W*C)
    # ypad_ref: (H+2, (W+2)*C)     bf16  scratch: padded conv1 activation
    _, _, WPC = xp_ref.shape
    _, H, WC = o_ref.shape
    C = (WPC - WC) // 2              # Cin == Cout

    # ---- conv1: 3 MXU matmuls (one per ky), 288-deep bf16 contraction --------
    acc = jnp.zeros((H, WC), jnp.float32)
    for dy in range(3):
        lhs = xp_ref[0, dy:dy + H, :].astype(jnp.bfloat16)          # (H, (W+2)*C)
        acc = acc + jnp.dot(lhs, w1_ref[dy],
                            preferred_element_type=jnp.float32)     # (H, W*C)

    # BN1 (folded) -> Dropout2d (identity in eval) -> LeakyReLU(0.02)
    y = acc * bn_ref[0:1, :] + bn_ref[1:2, :]
    # TODO(synk): training-mode Dropout2d (per-channel Bernoulli mask) not implemented; eval = identity.
    y = jnp.where(y > 0, y, 0.02 * y)

    # ---- stage padded conv1 activation in scratch (zero borders only) --------
    yb = y.astype(jnp.bfloat16)
    ypad_ref[0:1, :] = jnp.zeros((1, WPC), jnp.bfloat16)
    ypad_ref[H + 1:H + 2, :] = jnp.zeros((1, WPC), jnp.bfloat16)
    ypad_ref[1:H + 1, 0:C] = jnp.zeros((H, C), jnp.bfloat16)
    ypad_ref[1:H + 1, WPC - C:WPC] = jnp.zeros((H, C), jnp.bfloat16)
    ypad_ref[1:H + 1, C:WPC - C] = yb

    # ---- conv2 -> BN2 -> LeakyReLU --------------------------------------------
    acc2 = jnp.zeros((H, WC), jnp.float32)
    for dy in range(3):
        acc2 = acc2 + jnp.dot(ypad_ref[dy:dy + H, :], w2_ref[dy],
                              preferred_element_type=jnp.float32)
    z = acc2 * bn_ref[2:3, :] + bn_ref[3:4, :]
    z = jnp.where(z > 0, z, 0.02 * z)

    # ---- residual add (full-precision x, lane-dense unmasked store) ----------
    x_in = xp_ref[0, 1:H + 1, C:WPC - C]                            # (H, W*C) f32
    o_ref[0] = (z + x_in).astype(o_ref.dtype)


def _band_weights(w, W):
    """HWIO (3,3,Cin,Cout) conv weight -> (3, (W+2)*Cin, W*Cout) block-banded, bf16.

    M[dy, (w+dx)*Cin + ci, w*Cout + co] == w[dy, dx, ci, co], so a 3x3 'same' conv
    on a lane-dense padded row block becomes  acc += rows[dy:dy+H, :] @ M[dy]."""
    ky, kx, Cin, Cout = w.shape
    M = jnp.zeros((ky, (W + 2) * Cin, W * Cout), w.dtype)
    for dy in range(ky):
        krow = w[dy].reshape(kx * Cin, Cout)          # rows ordered (dx, ci)
        for col in range(W):
            M = M.at[dy,
                     col * Cin:(col + kx) * Cin,
                     col * Cout:(col + 1) * Cout].set(krow)
    return M.astype(jnp.bfloat16)


def context_forward(x, w1, w2, bn_params):
    """x: (N, H, W, C) NHWC; w1/w2: (3,3,C,C) HWIO; bn_params: (4, C) =
    [scale1, shift1, scale2, shift2] (BatchNorm folded into scale/shift)."""
    N, H, W, C = x.shape
    WC, WPC = W * C, (W + 2) * C

    # Pre-padded, lane-dense input (free-ish wrapper-side XLA ops).
    xp = jnp.pad(x, ((0, 0), (1, 1), (1, 1), (0, 0))).reshape(N, H + 2, WPC)
    w1b = _band_weights(w1, W)
    w2b = _band_weights(w2, W)
    bn_t = jnp.tile(bn_params, (1, W))                # (4, W*C): per-lane scale/shift

    out = pl.pallas_call(
        context_kernel,
        out_shape=jax.ShapeDtypeStruct((N, H, WC), x.dtype),
        grid_spec=pltpu.PrefetchScalarGridSpec(
            num_scalar_prefetch=0,
            grid=(N,),
            in_specs=[
                pl.BlockSpec((1, H + 2, WPC), lambda n: (n, 0, 0)),
                pl.BlockSpec((3, WPC, WC), lambda n: (0, 0, 0)),
                pl.BlockSpec((3, WPC, WC), lambda n: (0, 0, 0)),
                pl.BlockSpec((4, WC), lambda n: (0, 0)),
            ],
            out_specs=pl.BlockSpec((1, H, WC), lambda n: (n, 0, 0)),
            scratch_shapes=[pltpu.VMEM((H + 2, WPC), jnp.bfloat16)],
        ),
        compiler_params=pltpu.CompilerParams(
            dimension_semantics=("parallel",)),          # batch axis -> 2 TCs on v7x
    )(xp, w1b, w2b, bn_t)
    return out.reshape(N, H, W, C)


def reference_forward(x, w1, w2, bn_params):
    """Pure-JAX f32 reference of the same (eval-mode) forward pass."""
    def conv(a, w):
        return jax.lax.conv_general_dilated(
            a, w, window_strides=(1, 1), padding="SAME",
            dimension_numbers=("NHWC", "HWIO", "NHWC"))
    y = conv(x, w1) * bn_params[0] + bn_params[1]
    y = jnp.where(y > 0, y, 0.02 * y)
    y = conv(y, w2) * bn_params[2] + bn_params[3]
    y = jnp.where(y > 0, y, 0.02 * y)
    return y + x


if __name__ == "__main__":
    # Context(in_channels, out_channels) requires in == out for the residual add.
    N, C, H, W = 2, 16, 16, 16
    key = jax.random.PRNGKey(0)
    keys = jax.random.split(key, 10)

    # Input (PyTorch would be NCHW [2,16,16,16]; we use NHWC [2,16,16,16]).
    x = jax.random.normal(keys[0], (N, H, W, C), jnp.float32)

    # Conv weights, HWIO (equivalent to torch OIHW transposed).
    w1 = jax.random.normal(keys[1], (3, 3, C, C), jnp.float32) * 0.1
    w2 = jax.random.normal(keys[2], (3, 3, C, C), jnp.float32) * 0.1

    # Deterministic BatchNorm parameters, folded into scale/shift (eval mode).
    eps = 1e-5
    gamma1 = 1.0 + 0.1 * jax.random.normal(keys[3], (C,), jnp.float32)
    beta1 = 0.1 * jax.random.normal(keys[4], (C,), jnp.float32)
    mean1 = 0.1 * jax.random.normal(keys[5], (C,), jnp.float32)
    var1 = jnp.abs(jax.random.normal(keys[6], (C,), jnp.float32)) + 0.5
    gamma2 = 1.0 + 0.1 * jax.random.normal(keys[7], (C,), jnp.float32)
    beta2 = 0.1 * jax.random.normal(keys[8], (C,), jnp.float32)
    mean2 = 0.1 * jax.random.normal(keys[9], (C,), jnp.float32)
    var2 = jnp.ones((C,), jnp.float32)

    scale1 = gamma1 / jnp.sqrt(var1 + eps)
    shift1 = beta1 - mean1 * scale1
    scale2 = gamma2 / jnp.sqrt(var2 + eps)
    shift2 = beta2 - mean2 * scale2
    bn_params = jnp.stack([scale1, shift1, scale2, shift2], axis=0)  # (4, C)

    out = context_forward(x, w1, w2, bn_params)
    out = jax.block_until_ready(out)

    ref = reference_forward(x, w1, w2, bn_params)
    assert out.shape == (N, H, W, C)
    # bf16 MXU operands (per perf review) => compare against the f32 reference
    # with a correspondingly relaxed tolerance.
    assert jnp.allclose(out, ref, atol=5e-2, rtol=5e-2), "mismatch vs reference"

    print("KERNEL_OK")
</pallas_src>

<mosaic_0001>
module attributes {stable_mosaic.version = 11 : i64} {
  func.func @context_kernel(%arg0: i32, %arg1: memref<1x18x288xf32, #tpu.memory_space<vmem>>, %arg2: memref<3x288x256xbf16, #tpu.memory_space<vmem>>, %arg3: memref<3x288x256xbf16, #tpu.memory_space<vmem>>, %arg4: memref<4x256xf32, #tpu.memory_space<vmem>>, %arg5: memref<1x16x256xf32, #tpu.memory_space<vmem>>, %arg6: memref<18x288xbf16, #tpu.memory_space<vmem>>) attributes {dimension_semantics = [#tpu.dimension_semantics<parallel>], iteration_bounds = array<i64: 2>, scalar_prefetch = 0 : i64, scratch_operands = 1 : i64, tpu.core_type = #tpu.core_type<tc>, window_params = [{transform_indices = @transform_0, window_bounds = array<i64: 1, 18, 288>}, {pipeline_mode = #tpu.pipeline_mode<synchronous>, transform_indices = @transform_1, window_bounds = array<i64: 3, 288, 256>}, {pipeline_mode = #tpu.pipeline_mode<synchronous>, transform_indices = @transform_2, window_bounds = array<i64: 3, 288, 256>}, {pipeline_mode = #tpu.pipeline_mode<synchronous>, transform_indices = @transform_3, window_bounds = array<i64: 4, 256>}, {transform_indices = @transform_4, window_bounds = array<i64: 1, 16, 256>}]} {
    %cst = arith.constant 0.000000e+00 : f32
    %0 = vector.broadcast %cst : f32 to vector<16x256xf32>
    %c0 = arith.constant 0 : index
    %c0_0 = arith.constant 0 : index
    %c0_1 = arith.constant 0 : index
    %1 = vector.load %arg1[%c0, %c0_0, %c0_1] : memref<1x18x288xf32, #tpu.memory_space<vmem>>, vector<1x16x288xf32>
    %2 = vector.shape_cast %1 : vector<1x16x288xf32> to vector<16x288xf32>
    %3 = arith.truncf %2 : vector<16x288xf32> to vector<16x288xbf16>
    %c0_2 = arith.constant 0 : index
    %c0_3 = arith.constant 0 : index
    %c0_4 = arith.constant 0 : index
    %4 = vector.load %arg2[%c0_2, %c0_3, %c0_4] : memref<3x288x256xbf16, #tpu.memory_space<vmem>>, vector<1x288x256xbf16>
    %5 = vector.shape_cast %4 : vector<1x288x256xbf16> to vector<288x256xbf16>
    %cst_5 = arith.constant dense<0.000000e+00> : vector<16x256xf32>
    %6 = tpu.matmul %3, %5, %cst_5 {dimension_numbers = #tpu.dot_dimension_numbers<[1], [0], [0], [1], [0, 0, 1, 1], [], []>} : vector<16x288xbf16>, vector<288x256xbf16>, vector<16x256xf32> -> vector<16x256xf32>
    %7 = arith.addf %0, %6 : vector<16x256xf32>
    %c0_6 = arith.constant 0 : index
    %c1 = arith.constant 1 : index
    %c0_7 = arith.constant 0 : index
    %8 = vector.load %arg1[%c0_6, %c1, %c0_7] : memref<1x18x288xf32, #tpu.memory_space<vmem>>, vector<1x16x288xf32>
    %9 = vector.shape_cast %8 : vector<1x16x288xf32> to vector<16x288xf32>
    %10 = arith.truncf %9 : vector<16x288xf32> to vector<16x288xbf16>
    %c1_8 = arith.constant 1 : index
    %c0_9 = arith.constant 0 : index
    %c0_10 = arith.constant 0 : index
    %11 = vector.load %arg2[%c1_8, %c0_9, %c0_10] : memref<3x288x256xbf16, #tpu.memory_space<vmem>>, vector<1x288x256xbf16>
    %12 = vector.shape_cast %11 : vector<1x288x256xbf16> to vector<288x256xbf16>
    %cst_11 = arith.constant dense<0.000000e+00> : vector<16x256xf32>
    %13 = tpu.matmul %10, %12, %cst_11 {dimension_numbers = #tpu.dot_dimension_numbers<[1], [0], [0], [1], [0, 0, 1, 1], [], []>} : vector<16x288xbf16>, vector<288x256xbf16>, vector<16x256xf32> -> vector<16x256xf32>
    %14 = arith.addf %7, %13 : vector<16x256xf32>
    %c0_12 = arith.constant 0 : index
    %c2 = arith.constant 2 : index
    %c0_13 = arith.constant 0 : index
    %15 = vector.load %arg1[%c0_12, %c2, %c0_13] : memref<1x18x288xf32, #tpu.memory_space<vmem>>, vector<1x16x288xf32>
    %16 = vector.shape_cast %15 : vector<1x16x288xf32> to vector<16x288xf32>
    %17 = arith.truncf %16 : vector<16x288xf32> to vector<16x288xbf16>
    %c2_14 = arith.constant 2 : index
    %c0_15 = arith.constant 0 : index
    %c0_16 = arith.constant 0 : index
    %18 = vector.load %arg2[%c2_14, %c0_15, %c0_16] : memref<3x288x256xbf16, #tpu.memory_space<vmem>>, vector<1x288x256xbf16>
    %19 = vector.shape_cast %18 : vector<1x288x256xbf16> to vector<288x256xbf16>
    %cst_17 = arith.constant dense<0.000000e+00> : vector<16x256xf32>
    %20 = tpu.matmul %17, %19, %cst_17 {dimension_numbers = #tpu.dot_dimension_numbers<[1], [0], [0], [1], [0, 0, 1, 1], [], []>} : vector<16x288xbf16>, vector<288x256xbf16>, vector<16x256xf32> -> vector<16x256xf32>
    %21 = arith.addf %14, %20 : vector<16x256xf32>
    %c0_18 = arith.constant 0 : index
    %c0_19 = arith.constant 0 : index
    %22 = vector.load %arg4[%c0_18, %c0_19] : memref<4x256xf32, #tpu.memory_space<vmem>>, vector<1x256xf32>
    %23 = vector.broadcast %22 : vector<1x256xf32> to vector<16x256xf32>
    %24 = arith.mulf %21, %23 : vector<16x256xf32>
    %c1_20 = arith.constant 1 : index
    %c0_21 = arith.constant 0 : index
    %25 = vector.load %arg4[%c1_20, %c0_21] : memref<4x256xf32, #tpu.memory_space<vmem>>, vector<1x256xf32>
    %26 = vector.broadcast %25 : vector<1x256xf32> to vector<16x256xf32>
    %27 = arith.addf %24, %26 : vector<16x256xf32>
    %cst_22 = arith.constant 0.000000e+00 : f32
    %28 = vector.broadcast %cst_22 : f32 to vector<16x256xf32>
    %29 = arith.cmpf ogt, %27, %28 : vector<16x256xf32>
    %cst_23 = arith.constant 2.000000e-02 : f32
    %30 = vector.broadcast %cst_23 : f32 to vector<16x256xf32>
    %31 = arith.mulf %30, %27 : vector<16x256xf32>
    %32 = arith.select %29, %27, %31 : vector<16x256xi1>, vector<16x256xf32>
    %33 = arith.truncf %32 : vector<16x256xf32> to vector<16x256xbf16>
    %cst_24 = arith.constant 0.000000e+00 : bf16
    %34 = vector.broadcast %cst_24 : bf16 to vector<1x288xbf16>
    %c0_25 = arith.constant 0 : index
    %c0_26 = arith.constant 0 : index
    %35 = vector.load %arg6[%c0_25, %c0_26] : memref<18x288xbf16, #tpu.memory_space<vmem>>, vector<1x288xbf16>
    tpu.vector_store %arg6[%c0_25, %c0_26], %34 {strides = array<i32>} : memref<18x288xbf16, #tpu.memory_space<vmem>>, vector<1x288xbf16>,
    %cst_27 = arith.constant 0.000000e+00 : bf16
    %36 = vector.broadcast %cst_27 : bf16 to vector<1x288xbf16>
    %c17 = arith.constant 17 : index
    %c0_28 = arith.constant 0 : index
    %37 = vector.load %arg6[%c17, %c0_28] : memref<18x288xbf16, #tpu.memory_space<vmem>>, vector<1x288xbf16>
    tpu.vector_store %arg6[%c17, %c0_28], %36 {strides = array<i32>} : memref<18x288xbf16, #tpu.memory_space<vmem>>, vector<1x288xbf16>,
    %cst_29 = arith.constant 0.000000e+00 : bf16
    %38 = vector.broadcast %cst_29 : bf16 to vector<16x16xbf16>
    %c1_30 = arith.constant 1 : index
    %c0_31 = arith.constant 0 : index
    %39 = vector.load %arg6[%c1_30, %c0_31] : memref<18x288xbf16, #tpu.memory_space<vmem>>, vector<16x16xbf16>
    tpu.vector_store %arg6[%c1_30, %c0_31], %38 {strides = array<i32>} : memref<18x288xbf16, #tpu.memory_space<vmem>>, vector<16x16xbf16>,
    %cst_32 = arith.constant 0.000000e+00 : bf16
    %40 = vector.broadcast %cst_32 : bf16 to vector<16x16xbf16>
    %c1_33 = arith.constant 1 : index
    %c272 = arith.constant 272 : index
    %41 = vector.load %arg6[%c1_33, %c272] : memref<18x288xbf16, #tpu.memory_space<vmem>>, vector<16x16xbf16>
    tpu.vector_store %arg6[%c1_33, %c272], %40 {strides = array<i32>} : memref<18x288xbf16, #tpu.memory_space<vmem>>, vector<16x16xbf16>,
    %c1_34 = arith.constant 1 : index
    %c16 = arith.constant 16 : index
    %42 = vector.load %arg6[%c1_34, %c16] : memref<18x288xbf16, #tpu.memory_space<vmem>>, vector<16x256xbf16>
    tpu.vector_store %arg6[%c1_34, %c16], %33 {strides = array<i32>} : memref<18x288xbf16, #tpu.memory_space<vmem>>, vector<16x256xbf16>,
    %cst_35 = arith.constant 0.000000e+00 : f32
    %43 = vector.broadcast %cst_35 : f32 to vector<16x256xf32>
    %c0_36 = arith.constant 0 : index
    %c0_37 = arith.constant 0 : index
    %44 = vector.load %arg6[%c0_36, %c0_37] : memref<18x288xbf16, #tpu.memory_space<vmem>>, vector<16x288xbf16>
    %c0_38 = arith.constant 0 : index
    %c0_39 = arith.constant 0 : index
    %c0_40 = arith.constant 0 : index
    %45 = vector.load %arg3[%c0_38, %c0_39, %c0_40] : memref<3x288x256xbf16, #tpu.memory_space<vmem>>, vector<1x288x256xbf16>
    %46 = vector.shape_cast %45 : vector<1x288x256xbf16> to vector<288x256xbf16>
    %cst_41 = arith.constant dense<0.000000e+00> : vector<16x256xf32>
    %47 = tpu.matmul %44, %46, %cst_41 {dimension_numbers = #tpu.dot_dimension_numbers<[1], [0], [0], [1], [0, 0, 1, 1], [], []>} : vector<16x288xbf16>, vector<288x256xbf16>, vector<16x256xf32> -> vector<16x256xf32>
    %48 = arith.addf %43, %47 : vector<16x256xf32>
    %c1_42 = arith.constant 1 : index
    %c0_43 = arith.constant 0 : index
    %49 = vector.load %arg6[%c1_42, %c0_43] : memref<18x288xbf16, #tpu.memory_space<vmem>>, vector<16x288xbf16>
    %c1_44 = arith.constant 1 : index
    %c0_45 = arith.constant 0 : index
    %c0_46 = arith.constant 0 : index
    %50 = vector.load %arg3[%c1_44, %c0_45, %c0_46] : memref<3x288x256xbf16, #tpu.memory_space<vmem>>, vector<1x288x256xbf16>
    %51 = vector.shape_cast %50 : vector<1x288x256xbf16> to vector<288x256xbf16>
    %cst_47 = arith.constant dense<0.000000e+00> : vector<16x256xf32>
    %52 = tpu.matmul %49, %51, %cst_47 {dimension_numbers = #tpu.dot_dimension_numbers<[1], [0], [0], [1], [0, 0, 1, 1], [], []>} : vector<16x288xbf16>, vector<288x256xbf16>, vector<16x256xf32> -> vector<16x256xf32>
    %53 = arith.addf %48, %52 : vector<16x256xf32>
    %c2_48 = arith.constant 2 : index
    %c0_49 = arith.constant 0 : index
    %54 = vector.load %arg6[%c2_48, %c0_49] : memref<18x288xbf16, #tpu.memory_space<vmem>>, vector<16x288xbf16>
    %c2_50 = arith.constant 2 : index
    %c0_51 = arith.constant 0 : index
    %c0_52 = arith.constant 0 : index
    %55 = vector.load %arg3[%c2_50, %c0_51, %c0_52] : memref<3x288x256xbf16, #tpu.memory_space<vmem>>, vector<1x288x256xbf16>
    %56 = vector.shape_cast %55 : vector<1x288x256xbf16> to vector<288x256xbf16>
    %cst_53 = arith.constant dense<0.000000e+00> : vector<16x256xf32>
    %57 = tpu.matmul %54, %56, %cst_53 {dimension_numbers = #tpu.dot_dimension_numbers<[1], [0], [0], [1], [0, 0, 1, 1], [], []>} : vector<16x288xbf16>, vector<288x256xbf16>, vector<16x256xf32> -> vector<16x256xf32>
    %58 = arith.addf %53, %57 : vector<16x256xf32>
    %c2_54 = arith.constant 2 : index
    %c0_55 = arith.constant 0 : index
    %59 = vector.load %arg4[%c2_54, %c0_55] : memref<4x256xf32, #tpu.memory_space<vmem>>, vector<1x256xf32>
    %60 = vector.broadcast %59 : vector<1x256xf32> to vector<16x256xf32>
    %61 = arith.mulf %58, %60 : vector<16x256xf32>
    %c3 = arith.constant 3 : index
    %c0_56 = arith.constant 0 : index
    %62 = vector.load %arg4[%c3, %c0_56] : memref<4x256xf32, #tpu.memory_space<vmem>>, vector<1x256xf32>
    %63 = vector.broadcast %62 : vector<1x256xf32> to vector<16x256xf32>
    %64 = arith.addf %61, %63 : vector<16x256xf32>
    %cst_57 = arith.constant 0.000000e+00 : f32
    %65 = vector.broadcast %cst_57 : f32 to vector<16x256xf32>
    %66 = arith.cmpf ogt, %64, %65 : vector<16x256xf32>
    %cst_58 = arith.constant 2.000000e-02 : f32
    %67 = vector.broadcast %cst_58 : f32 to vector<16x256xf32>
    %68 = arith.mulf %67, %64 : vector<16x256xf32>
    %69 = arith.select %66, %64, %68 : vector<16x256xi1>, vector<16x256xf32>
    %c0_59 = arith.constant 0 : index
    %c1_60 = arith.constant 1 : index
    %c16_61 = arith.constant 16 : index
    %70 = vector.load %arg1[%c0_59, %c1_60, %c16_61] : memref<1x18x288xf32, #tpu.memory_space<vmem>>, vector<1x16x256xf32>
    %71 = vector.shape_cast %70 : vector<1x16x256xf32> to vector<16x256xf32>
    %72 = arith.addf %69, %71 : vector<16x256xf32>
    %c0_62 = arith.constant 0 : index
    %c0_63 = arith.constant 0 : index
    %c0_64 = arith.constant 0 : index
    %73 = vector.load %arg5[%c0_62, %c0_63, %c0_64] : memref<1x16x256xf32, #tpu.memory_space<vmem>>, vector<1x16x256xf32>
    %74 = vector.shape_cast %73 : vector<1x16x256xf32> to vector<16x256xf32>
    %75 = vector.shape_cast %72 : vector<16x256xf32> to vector<1x16x256xf32>
    tpu.vector_store %arg5[%c0_62, %c0_63, %c0_64], %75 {strides = array<i32>} : memref<1x16x256xf32, #tpu.memory_space<vmem>>, vector<1x16x256xf32>,
    return
  }
  func.func @transform_0(%arg0: i32) -> (i32, i32, i32) {
    %c0_i32 = arith.constant 0 : i32
    %c0_i32_0 = arith.constant 0 : i32
    %c0_i32_1 = arith.constant 0 : i32
    return %arg0, %c0_i32, %c0_i32_0 : i32, i32, i32
  }
  func.func @transform_1(%arg0: i32) -> (i32, i32, i32) {
    %c0_i32 = arith.constant 0 : i32
    %c0_i32_0 = arith.constant 0 : i32
    %c0_i32_1 = arith.constant 0 : i32
    %c0_i32_2 = arith.constant 0 : i32
    return %c0_i32, %c0_i32_0, %c0_i32_1 : i32, i32, i32
  }
  func.func @transform_2(%arg0: i32) -> (i32, i32, i32) {
    %c0_i32 = arith.constant 0 : i32
    %c0_i32_0 = arith.constant 0 : i32
    %c0_i32_1 = arith.constant 0 : i32
    %c0_i32_2 = arith.constant 0 : i32
    return %c0_i32, %c0_i32_0, %c0_i32_1 : i32, i32, i32
  }
  func.func @transform_3(%arg0: i32) -> (i32, i32) {
    %c0_i32 = arith.constant 0 : i32
    %c0_i32_0 = arith.constant 0 : i32
    %c0_i32_1 = arith.constant 0 : i32
    return %c0_i32, %c0_i32_0 : i32, i32
  }
  func.func @transform_4(%arg0: i32) -> (i32, i32, i32) {
    %c0_i32 = arith.constant 0 : i32
    %c0_i32_0 = arith.constant 0 : i32
    %c0_i32_1 = arith.constant 0 : i32
    return %arg0, %c0_i32, %c0_i32_0 : i32, i32, i32
  }
}

</mosaic_0001>

<bundles_post_ra>
// kernel: tpu_custom_call.1
= control target key start
LH: loop header
LB: loop body
LE: loop exit
PB: predicated region body
PF: predicated region fallthrough
CT: control target
= control target key end

     0   :  { %9 = vsyncpa [#allocation4], 0  ;;  %s3861_s0 = inlined_call_operand.vmem [shape: f32[2,18,288], index: 0, kind: input, shape index: {}]   ;;  %s3862_s1 = inlined_call_operand.hbm [shape: bf16[3,288,256], index: 1, kind: input, shape index: {}]   ;;  %s3863_s2 = inlined_call_operand.hbm [shape: bf16[3,288,256], index: 2, kind: input, shape index: {}]   ;;  %s3864_s3 = inlined_call_operand.vmem [shape: f32[4,256], index: 3, kind: input, shape index: {}]   ;;  %s3865_s4 = inlined_call_operand.hbm [shape: f32[2,16,256], index: 4, kind: output, shape index: {}]  }
   0x1   :  { %10 = vsyncpa [#allocation7], 0 }
   0x2   :  { %11 = vsyncpa [#allocation5], 0 }
   0x3   :  { %13 = vsyncpa [#allocation5 + $0x1], 0  ;;  %s3477_s15 = smov 0   ;;  %s3479_s16 = smov 0  }
   0x4   :  { %s3481_s17 = smov 0   ;;  %s3483_s18 = smov 0  }
   0x5 LB: > { %s3498_s19 = sadd.s32 4294967295, %s3441_s18   ;;  %s2623_s20 = sadd.s32 4294967294, %s3441_s18   ;;  %s3441_s18 = sphi %s3483_s18, %s3903_s18   ;;  %s3437_s17 = sphi %s3481_s17, %s3902_s17   ;;  %s3433_s16 = sphi %s3479_s16, %s3901_s16   ;;  %s3429_s15 = sphi %s3477_s15, %s3900_s15  }
   0x6   : > { %s3502_s21 = sadd.s32 1, %s3441_s18   ;;  %s115_s22 = sadd.s32 1, %s3437_s17 }
   0x7   : > { %s112_s23 = ssub.s32 %s3441_s18, %s3502_s21  ;;  %p125_p0 = scmp.ne.s32.totalorder %s3437_s17, %s3433_s16 }
   0x8   : > { %p113_p1 = scmp.eq.s32.totalorder %s112_s23, 0  ;;  %p126_p2 = scmp.eq.s32.totalorder %s3498_s19, 1 }
   0x9   : > { %p131_p3 = scmp.ne.s32.totalorder %s3433_s16, %s3429_s15  ;;  %p132_p4 = scmp.eq.s32.totalorder %s2623_s20, 1 }
   0xa   : > { %s3513_s24 = scalar_select %p113_p1, %s3437_s17, %s115_s22  }
   0xb   : > { %p3515_p5 = por %p126_p2, %p125_p0  ;;  %p3519_p6 = por %p132_p4, %p131_p3 }
   0xc   : > { %p2624_p7 = scmp.ge.s32.totalorder %s3441_s18, 1  ;;  %p139_p8 = scmp.lt.s32.totalorder %s3441_s18, 3 }
   0xd   : > { %s3871_s25 = scalar_select %p3515_p5, 1, 0 }
   0xe   : > { %s3872_s26 = scalar_select %p3519_p6, 1, 0 }
   0xf   : > { %p3866_p9 = scmp.eq.s32.totalorder %s3498_s19, 0  ;;  %p3526_p10 = pnand %p2624_p7, %p139_p8 }
  0x10   : > { %s3443_s28 = smov [#allocation3]   ;;  %s3444_s5 = smov [#allocation6]  }
  0x11   : > { %s3873_s27 = scalar_select %p3526_p10, 1, 0 }
  0x12   : > { %s151_s29 = sshll.u32 %s3443_s28, 4  ;;  %p2928_p11 = pneg %p3526_p10  ;;  %s152_s29 = int_to_ptr.vmem [resolvable:$true] %s151_s29 }
  0x13   : > { %s164_s6 = sshll.u32 %s3444_s5, 4  ;;  %s3315_s9 = scalar_lea.hbm %s3862_s1, 13824  ;;  %s3538_s6 = int_to_ptr.vmem [resolvable:$true] %s164_s6 }
  0x14   : > { %p3534_p12 = pnand %p3866_p9, %p2928_p11  ;;  %p3316_p13 = scmp.ne.s32.totalorder %s3862_s1, %s3315_s9 }
  0x15   : > { %p3322_p3 = scmp.lt.u32.totalorder %s3315_s9, %s3862_s1 }
  0x16   : > { %p3317_p0 = pneg %p3534_p12 }
  0x18   : > { %p3318_p1 = pnand %p3317_p0, %p3316_p13 }
  0x1a   : > { %p3319_p2 = pneg %p3318_p1 }
  0x1c   : > { %p3324_p4 = pnand %p3322_p3, %p3319_p2 }
  0x1e   : > { %3327 = shalt.err (!%p3324_p4)
}
  0x1f   : > { %s3328_s14 = scalar_lea.vmem %s152_s29, 13824  ;;  %p3336_p9 = scmp.lt.s32.totalorder %s152_s29, %s152_s29 }
  0x20   : > { %p3329_p7 = scmp.ne.s32.totalorder %s152_s29, %s3328_s14  ;;  %p3337_p6 = scmp.lt.s32.totalorder %s3328_s14, %s3328_s14 }
  0x22   : > { %p3331_p8 = pnand %p3329_p7, %p3317_p0  ;;  %p3338_p5 = por %p3337_p6, %p3336_p9 }
  0x24   : > { %p3332_p11 = pneg %p3331_p8 }
  0x26   : > { %p3339_p10 = pnand %p3338_p5, %p3332_p11 }
  0x28   : > { %3342 = shalt.err (!%p3339_p10)
}
  0x29   : > { %s3445_s20 = smov 128   ;;  %s3446_s22 = smov 8  }
  0x2a   : > { %2931 = dma.hbm_to_vmem [thread:$0]  (!%p3534_p12), %s3862_s1, 13824, %s152_s29, [#allocation4], %s3445_s20, %s3445_s20, %s3446_s22  }
  0x2b   : > { %s3343_s8 = scalar_lea.hbm %s3863_s2, 13824 }
  0x2c   : > { %p3344_p13 = scmp.ne.s32.totalorder %s3863_s2, %s3343_s8  ;;  %p3350_p9 = scmp.lt.u32.totalorder %s3343_s8, %s3863_s2 }
  0x2e   : > { %p3346_p5 = pnand %p3344_p13, %p3317_p0 }
  0x30   : > { %p3347_p6 = pneg %p3346_p5 }
  0x32   : > { %p3352_p10 = pnand %p3350_p9, %p3347_p6 }
  0x34   : > { %3355 = shalt.err (!%p3352_p10)
}
  0x35   : > { %s3356_s29 = scalar_lea.vmem %s3538_s6, 13824  ;;  %p3364_p4 = scmp.lt.s32.totalorder %s3538_s6, %s3538_s6 }
  0x36   : > { %p3357_p1 = scmp.ne.s32.totalorder %s3538_s6, %s3356_s29  ;;  %p3365_p7 = scmp.lt.s32.totalorder %s3356_s29, %s3356_s29 }
  0x38   : > { %p3359_p2 = pnand %p3357_p1, %p3317_p0  ;;  %p3366_p8 = por %p3365_p7, %p3364_p4 }
  0x3a   : > { %p3360_p3 = pneg %p3359_p2 }
  0x3c   : > { %p3367_p11 = pnand %p3366_p8, %p3360_p3 }
  0x3e   : > { %3370 = shalt.err (!%p3367_p11)
}
  0x3f   : > { %2934 = dma.hbm_to_vmem [thread:$0]  (!%p3534_p12), %s3863_s2, 13824, %s3538_s6, [#allocation7], %s3445_s20, %s3445_s20, %s3446_s22  }
  0x40   : > { %p3875_p13 = scmp.ne.s32.totalorder %s3873_s27, 0 }
  0x41   : > { %p3876_p5 = scmp.eq.s32.totalorder (!%p3875_p13), %s3498_s19, 0 }
  0x42   : > { %191 = sbr.rel (%p3875_p13) target bundleno = 1078 (0x436), region = 36 }
  0x49   : > { %3416 = dma.done.wait (%p3876_p5), [#allocation4], 13824   ;;  %p3877_p0 = pmov %p3876_p5 }
  0x4b   : > { %3418 = vsyncadd (%p3877_p0), [#allocation4], 4294953472  ;;  %p3878_p6 = pmov %p3877_p0 }
  0x4c   : > { %p3879_p9 = pmov %p3877_p0 }
  0x4d   : > { %3420 = dma.done.wait (%p3878_p6), [#allocation7], 13824  }
  0x4e   : > { %3422 = vsyncadd (%p3879_p9), [#allocation7], 4294953472  ;;  %v2984_v0 = vld [vmem:[#allocation3 + $0x124] ss:$8 sps:$4 sm:$0xff]   ;;  %v2986_v1 = vld [vmem:[#allocation3 + $0x120] ss:$8 sps:$4 sm:$0xff]  }
  0x4f   : > { %544 = vmatprep.subr.bf16.mxu0 %v2984_v0  ;;  %v2987_v2 = vld [vmem:[#allocation3 + $0x134] ss:$8 sps:$4 sm:$0xff]   ;;  %v2989_v3 = vld [vmem:[#allocation3 + $0x130] ss:$8 sps:$4 sm:$0xff]   ;;  %v2990_v4 = vld [vmem:[#allocation3 + $0x144] ss:$8 sps:$4 sm:$0xff]  }
  0x50   : > { %545 = vmatpush1.bf16.msra.mxu0 %v2986_v1  ;;  %p221_p12 = scmp.lt.s32.totalorder %s3498_s19, 1  ;;  %v2992_v5 = vld [vmem:[#allocation3 + $0x140] ss:$8 sps:$4 sm:$0xff]   ;;  %v2993_v6 = vld [vmem:[#allocation3 + $0x154] ss:$8 sps:$4 sm:$0xff]   ;;  %vm3869_vm1 = vcmask 261120  }
  0x51   : > { %546 = vmatprep.subr.bf16.mxu0 %v2987_v2  ;;  %v2995_v7 = vld [vmem:[#allocation3 + $0x150] ss:$8 sps:$4 sm:$0xff]   ;;  %v2996_v8 = vld [vmem:[#allocation3 + $0x164] ss:$8 sps:$4 sm:$0xff]   ;;  %v2998_v9 = vld [vmem:[#allocation3 + $0x160] ss:$8 sps:$4 sm:$0xff]  }
  0x52   : > { %s222_s27 = scalar_select %p221_p12, %s3498_s19, 1  ;;  %v2999_v10 = vld [vmem:[#allocation3 + $0x174] ss:$8 sps:$4 sm:$0xff]   ;;  %v3001_v11 = vld [vmem:[#allocation3 + $0x170] ss:$8 sps:$4 sm:$0xff]   ;;  %v3447_v2 = vmov 0  }
  0x53   : > { %v3002_v12 = vld [vmem:[#allocation3 + $0x184] ss:$8 sps:$4 sm:$0xff]   ;;  %v3004_v17 = vld [vmem:[#allocation3 + $0x180] ss:$8 sps:$4 sm:$0xff]   ;;  %v3005_v19 = vld [vmem:[#allocation3 + $0x194] ss:$8 sps:$4 sm:$0xff]  }
  0x54   : > { %547 = vmatpush1.bf16.msra.mxu0 %v2989_v3  ;;  %s2917_s30 = smul.u32 72, %s222_s27  ;;  %v3007_v24 = vld [vmem:[#allocation3 + $0x190] ss:$8 sps:$4 sm:$0xff]   ;;  %vm3870_vm0 = vsmask.f32 7424  ;;  %vm954_vm2 = vcmask 1046528  }
  0x55   : > { %548 = vmatprep.subr.bf16.mxu0 %v2990_v4  ;;  %v3008_v26 = vld [vmem:[#allocation3 + $0x1a4] ss:$8 sps:$4 sm:$0xff]   ;;  %v3010_v29 = vld [vmem:[#allocation3 + $0x1a0] ss:$8 sps:$4 sm:$0xff]   ;;  %v3011_v30 = vld [vmem:[#allocation3 + $0x1b4] ss:$8 sps:$4 sm:$0xff]  }
  0x56   : > { %s3602_s22 = scalar_lea.vmem %s3861_s0, %s2917_s30  ;;  %v3013_v31 = vld [vmem:[#allocation3 + $0x1b0] ss:$8 sps:$4 sm:$0xff]   ;;  %v3014_v32 = vld [vmem:[#allocation3 + $0x1c4] ss:$8 sps:$4 sm:$0xff]   ;;  %v3016_v33 = vld [vmem:[#allocation3 + $0x1c0] ss:$8 sps:$4 sm:$0xff]  }
  0x57   : > { %v3605_v13 = vld [vmem:[%s3602_s22 + $0x20] sm:$0xff]  ;;  %v273_v14 = vld [vmem:[%s3602_s22 + $0x8] sm:$0xfe]  ;;  %v276_v15 = vld [vmem:[%s3602_s22 + $0x38] sm:$0x1]  ;;  %vm1286_vm4 = vcmask 1040384  }
  0x58   : > { %549 = vmatpush1.bf16.msra.mxu0 %v2992_v5  ;;  %v279_v16 = vpack.c.bf16 %v3605_v13, %v273_v14  ;;  %v282_v18 = vpack.c.bf16 %v276_v15, %v276_v15  ;;  %v3017_v34 = vld [vmem:[#allocation3 + $0x1d4] ss:$8 sps:$4 sm:$0xff]   ;;  %v3019_v35 = vld [vmem:[#allocation3 + $0x1d0] ss:$8 sps:$4 sm:$0xff]   ;;  %v3020_v36 = vld [vmem:[#allocation3 + $0x1e4] ss:$8 sps:$4 sm:$0xff]  }
  0x59   : > { %550 = vmatprep.subr.bf16.mxu0 %v2993_v6  ;;  %v3612_v37 = vld [vmem:[%s3602_s22 + $0x18] sm:$0xff]  ;;  %v272_v38 = vld [vmem:[%s3602_s22] sm:$0xfe]  ;;  %v3023_v40 = vld [vmem:[#allocation3 + $0x1f4] ss:$8 sps:$4 sm:$0xff]   ;;  %vm1289_vm5 = vcmask 1044484  }
  0x5a   : > { %v335_v20 = vshrl.u32 %v279_v16, 16  ;;  %v337_v21 = vshll.u32 %v279_v16, 16  ;;  %v342_v22 = vshll.u32 %v282_v18, 16  ;;  %v3022_v39 = vld [vmem:[#allocation3 + $0x1e0] ss:$8 sps:$4 sm:$0xff]   ;;  %v278_v41 = vpack.c.bf16 %v3612_v37, %v272_v38  ;;  %v3618_v52 = vld [vmem:[%s3602_s22 + $0x28] sm:$0xff] }
  0x5b   : > { %v275_v42 = vld [vmem:[%s3602_s22 + $0x30] sm:$0x1]  ;;  %v3025_v43 = vld [vmem:[#allocation3 + $0x1f0] ss:$8 sps:$4 sm:$0xff]   ;;  %v3026_v46 = vld [vmem:[#allocation3 + $0x204] ss:$8 sps:$4 sm:$0xff]  }
  0x5c   : > { %551 = vmatpush1.bf16.msra.mxu0 %v2995_v7  ;;  %v339_v23 = vrot.slane %v337_v21, 1  ;;  %v344_v25 = vrot.slane %v342_v22, 1  ;;  %v281_v44 = vpack.c.bf16 %v275_v42, %v275_v42  ;;  %v325_v45 = vshll.u32 %v278_v41, 16  ;;  %v3028_v47 = vld [vmem:[#allocation3 + $0x200] ss:$8 sps:$4 sm:$0xff]   ;;  %s3448_s8 = smov 16  }
  0x5d   : > { %552 = vmatprep.subr.bf16.mxu0 %v2996_v8  ;;  %v3029_v48 = vld [vmem:[#allocation3 + $0x214] ss:$8 sps:$4 sm:$0xff]   ;;  %v323_v49 = vshrl.u32 %v278_v41, 16  ;;  %v3031_v54 = vld [vmem:[#allocation3 + $0x210] ss:$8 sps:$4 sm:$0xff]   ;;  %vm1296_vm8 = vcmask 253952  }
  0x5e   : > { %v340_v27 = vor.u32 %v339_v23, %v335_v20  ;;  %v327_v50 = vrot.slane %v325_v45, 1  ;;  %v330_v51 = vshll.u32 %v281_v44, 16  ;;  %v274_v53 = vld [vmem:[%s3602_s22 + $0x10] sm:$0xfe]  ;;  %v3034_v58 = vld [vmem:[#allocation3 + $0x224] ss:$8 sps:$4 sm:$0xff]  }
  0x5f   : > { %v280_v57 = vpack.c.bf16 %v3618_v52, %v274_v53  ;;  %v277_v59 = vld [vmem:[%s3602_s22 + $0x40] sm:$0x1]  ;;  %v3032_v61 = vld [vmem:[#allocation3 + $0x220] ss:$8 sps:$4 sm:$0xff]   ;;  %v3037_v0 = vld [vmem:[#allocation3 + $0x234] ss:$8 sps:$4 sm:$0xff]  }
  0x60   : > { %553 = vmatpush1.bf16.msra.mxu0 %v2998_v9  ;;  %v345_v28 = vsel %vm3870_vm0, %v340_v27, %v344_v25  ;;  %v328_v55 = vor.u32 %v327_v50, %v323_v49  ;;  %v332_v56 = vrot.slane %v330_v51, 1  ;;  %v283_v62 = vpack.c.bf16 %v277_v59, %v277_v59  ;;  %v3035_v1 = vld [vmem:[#allocation3 + $0x230] ss:$8 sps:$4 sm:$0xff]   ;;  %v3040_v6 = vld [vmem:[#allocation3 + $0x4] ss:$8 sps:$4 sm:$0xff]   ;;  %s3449_s9 = smov 112  }
  0x61   : > { %554 = vmatprep.subr.bf16.mxu0 %v2999_v10  ;;  %576 = vmatprep.mubr.bf16.mxu0 %v345_v28  ;;  %v349_v63 = vshll.u32 %v280_v57, 16  ;;  %v347_v3 = vshrl.u32 %v280_v57, 16  ;;  %v228_v9 = vld [vmem:[%s3602_s22 + $0x8] sm:$0xff]  ;;  %v3038_v10 = vld [vmem:[#allocation3] ss:$8 sps:$4 sm:$0xff]   ;;  %v227_v45 = vld [vmem:[%s3602_s22] sm:$0xff] }
  0x62   : > { %v333_v60 = vsel %vm3870_vm0, %v328_v55, %v332_v56  ;;  %v354_v5 = vshll.u32 %v283_v62, 16  ;;  %v234_v14 = vpack.c.bf16 %v3605_v13, %v228_v9  ;;  %v3041_v15 = vld [vmem:[#allocation3 + $0x10] ss:$8 sps:$4 sm:$0xff]   ;;  %v3046_v16 = vld [vmem:[#allocation3 + $0x24] ss:$8 sps:$4 sm:$0xff]   ;;  %v229_v57 = vld [vmem:[%s3602_s22 + $0x10] sm:$0xff] }
  0x63   : > { %v351_v4 = vrot.slane %v349_v63, 1  ;;  %v3049_v18 = vld [vmem:[#allocation3 + $0x34] ss:$8 sps:$4 sm:$0xff]   ;;  %v3052_v20 = vld [vmem:[#allocation3 + $0x44] ss:$8 sps:$4 sm:$0xff]   ;;  %vm1313_vm9 = vcmask 125952  }
  0x64   : > { %555 = vmatpush1.bf16.msra.mxu0 %v3001_v11  ;;  %v356_v8 = vrot.slane %v354_v5, 1  ;;  %v3050_v21 = vld [vmem:[#allocation3 + $0x40] ss:$8 sps:$4 sm:$0xff]   ;;  %v3055_v22 = vld [vmem:[#allocation3 + $0x54] ss:$8 sps:$4 sm:$0xff]   ;;  %vm1325_vm14 = vcmask 257152  }
  0x65   : > { %556 = vmatprep.subr.bf16.mxu0 %v3002_v12  ;;  %v352_v7 = vor.u32 %v351_v4, %v347_v3  ;;  %v3043_v12 = vld [vmem:[#allocation3 + $0x14] ss:$8 sps:$4 sm:$0xff]   ;;  %v3053_v23 = vld [vmem:[#allocation3 + $0x50] ss:$8 sps:$4 sm:$0xff]   ;;  %v3056_v25 = vld [vmem:[#allocation3 + $0x60] ss:$8 sps:$4 sm:$0xff]  }
  0x66   : > { %v3059_v27 = vld [vmem:[#allocation3 + $0x70] ss:$8 sps:$4 sm:$0xff]   ;;  %v3064_v28 = vld [vmem:[#allocation3 + $0x84] ss:$8 sps:$4 sm:$0xff]   ;;  %v3074_v38 = vld [vmem:[#allocation3 + $0xc0] ss:$8 sps:$4 sm:$0xff]  }
  0x67   : > { %v357_v11 = vsel %vm3870_vm0, %v352_v7, %v356_v8  ;;  %v3082_v41 = vld [vmem:[#allocation3 + $0xe4] ss:$8 sps:$4 sm:$0xff]   ;;  %v3080_v42 = vld [vmem:[#allocation3 + $0xe0] ss:$8 sps:$4 sm:$0xff]   ;;  %v3083_v44 = vld [vmem:[#allocation3 + $0xf0] ss:$8 sps:$4 sm:$0xff]  }
  0x68   : > { %557 = vmatpush1.bf16.msra.mxu0 %v3004_v17  ;;  %v3044_v17 = vld [vmem:[#allocation3 + $0x20] ss:$8 sps:$4 sm:$0xff]   ;;  %v3091_v49 = vld [vmem:[#allocation3 + $0x114] ss:$8 sps:$4 sm:$0xff]   ;;  %v903_v51 = vld [vmem:[%s3602_s22 + $0x38] sm:$0x3] }
  0x69   : > { %558 = vmatprep.subr.bf16.mxu0 %v3005_v19  ;;  %v3047_v19 = vld [vmem:[#allocation3 + $0x30] ss:$8 sps:$4 sm:$0xff]   ;;  %v909_v56 = vpack.c.bf16 %v903_v51, %v903_v51  ;;  %v3097_v62 = vld [vmem:[#allocation3 + $0x254] ss:$8 sps:$4 sm:$0xff]   ;;  %v3106_v5 = vld [vmem:[#allocation3 + $0x284] ss:$8 sps:$4 sm:$0xff]  }
  0x6a   : > { %v900_v50 = vld [vmem:[%s3602_s22 + $0x8] sm:$0xfc]  ;;  %v3112_v9 = vld [vmem:[#allocation3 + $0x2a4] ss:$8 sps:$4 sm:$0xff]   ;;  %vm1287_vm3 = vsmask.f32 256 }
  0x6b   : > { %v3089_v53 = vld [vmem:[#allocation3 + $0x110] ss:$8 sps:$4 sm:$0xff]   ;;  %v906_v55 = vpack.c.bf16 %v3605_v13, %v900_v50  ;;  %v959_v59 = vrot.slane %v909_v56, 1  ;;  %v3100_v13 = vld [vmem:[#allocation3 + $0x264] ss:$8 sps:$4 sm:$0xff]   ;;  %vm1288_vm6 = vmand %vm1286_vm4, %vm1287_vm3  ;;  %vm1383_vm0 = vcmask 1043584  }
  0x6c   : > { %559 = vmatpush1.bf16.msra.mxu0 %v3007_v24  ;;  %v3058_v24 = vld [vmem:[#allocation3 + $0x64] ss:$8 sps:$4 sm:$0xff]   ;;  %v3103_v3 = vld [vmem:[#allocation3 + $0x274] ss:$8 sps:$4 sm:$0xff]   ;;  %v3101_v4 = vld [vmem:[#allocation3 + $0x270] ss:$8 sps:$4 sm:$0xff]  }
  0x6d   : > { %560 = vmatprep.subr.bf16.mxu0 %v3008_v26  ;;  %v3061_v26 = vld [vmem:[#allocation3 + $0x74] ss:$8 sps:$4 sm:$0xff]   ;;  %v3107_v8 = vld [vmem:[#allocation3 + $0x290] ss:$8 sps:$4 sm:$0xff]   ;;  %vm1290_vm7 = vsmask.f32 4352  ;;  %vm1297_vm15 = vmand %vm1296_vm8, %vm1287_vm3 }
  0x6e   : > { %v3109_v7 = vld [vmem:[#allocation3 + $0x294] ss:$8 sps:$4 sm:$0xff]   ;;  %v3151_v51 = vld [vmem:[#allocation6 + $0x130] ss:$8 sps:$4 sm:$0xff]   ;;  %vm3652_vm10 = vmand %vm1289_vm5, %vm1290_vm7  ;;  %vm1301_vm11 = vsmask.f32 7938 }
  0x6f   : > { %v3149_v50 = vld [vmem:[#allocation6 + $0x134] ss:$8 sps:$4 sm:$0xff]   ;;  %1319 = vst.msk [vmem:[#allocation2 + $0xc] sm:$0xf] %vm1313_vm9, %v3447_v2  ;;  %vm1292_vm12 = vmor %vm3652_vm10, %vm1288_vm6  ;;  %vm1303_vm13 = vsmask.f32 7954 }
  0x70   : > { %561 = vmatpush1.bf16.msra.mxu0 %v3010_v29  ;;  %v3062_v29 = vld [vmem:[#allocation3 + $0x80] ss:$8 sps:$4 sm:$0xff]   ;;  %1331 = vst.msk [vmem:[#allocation2 + $0x14] sm:$0xf] %vm1325_vm14, %v3447_v2  ;;  %vm1302_vm7 = vmand %vm1286_vm4, %vm1301_vm11  ;;  %s218_s13 = sand.u32 1, %s3433_s16   ;;  %s2876_s6 = sshll.u32 %s3498_s19, 9 }
  0x71   : > { %562 = vmatprep.subr.bf16.mxu0 %v3011_v30  ;;  %v3067_v30 = vld [vmem:[#allocation3 + $0x94] ss:$8 sps:$4 sm:$0xff]   ;;  %vm1304_vm6 = vmand %vm1289_vm5, %vm1303_vm13  ;;  %s2631_s14 = sshll.u32 %s218_s13, 5  ;;  %s3815_s23 = scalar_lea.hbm %s3865_s4, %s2876_s6 }
  0x72   : > { %vm3672_vm4 = vmand %vm1313_vm9, %vm1301_vm11  ;;  %s220_s27 = scalar_lea.vmem [#allocation8], %s2631_s14  ;;  %s3819_s19 = scalar_lea.sflag [#allocation5], %s218_s13 }
  0x73   : > { %vm1326_vm5 = vmand %vm1325_vm14, %vm1301_vm11  ;;  %s2539_s30 = sshll.u32 %s220_s27, 4  ;;  %p3898_p1 = scmp.ne.s32.totalorder %s3871_s25, 0  ;;  %s3810_s30 = int_to_ptr.vmem [resolvable:$true] %s2539_s30 }
  0x74   : > { %563 = vmatpush1.bf16.msra.mxu0 %v3013_v31  ;;  %v3065_v31 = vld [vmem:[#allocation3 + $0x90] ss:$8 sps:$4 sm:$0xff]   ;;  %s3371_s28 = scalar_lea.vmem %s3810_s30, 512  ;;  %s3450_s5 = smov [#allocation8]  }
  0x75   : > { %564 = vmatprep.subr.bf16.mxu0 %v3014_v32  ;;  %v3070_v32 = vld [vmem:[#allocation3 + $0xa4] ss:$8 sps:$4 sm:$0xff]   ;;  %p3372_p10 = scmp.ne.s32.totalorder %s3810_s30, %s3371_s28  ;;  %s3375_s7 = sshll.u32 %s3450_s5, 4  ;;  %s3376_s7 = int_to_ptr.vmem [resolvable:$false] %s3375_s7 }
  0x76   : > { %p3378_p4 = scmp.lt.s32.totalorder %s3810_s30, %s3376_s7 }
  0x77   : > { %p3373_p2 = pnand %p3372_p10, %p3898_p1 }
  0x78   : > { %565 = vmatpush1.bf16.msra.mxu0 %v3016_v33  ;;  %v3068_v33 = vld [vmem:[#allocation3 + $0xa0] ss:$8 sps:$4 sm:$0xff]  }
  0x79   : > { %566 = vmatprep.subr.bf16.mxu0 %v3017_v34  ;;  %v3073_v34 = vld [vmem:[#allocation3 + $0xb4] ss:$8 sps:$4 sm:$0xff]   ;;  %p3374_p3 = pneg %p3373_p2 }
  0x7c   : > { %567 = vmatpush1.bf16.msra.mxu0 %v3019_v35  ;;  %v3071_v35 = vld [vmem:[#allocation3 + $0xb0] ss:$8 sps:$4 sm:$0xff]  }
  0x7d   : > { %568 = vmatprep.subr.bf16.mxu0 %v3020_v36  ;;  %v3076_v36 = vld [vmem:[#allocation3 + $0xc4] ss:$8 sps:$4 sm:$0xff]  }
  0x80   : > { %569 = vmatpush1.bf16.msra.mxu0 %v3022_v39  ;;  %v3079_v39 = vld [vmem:[#allocation3 + $0xd4] ss:$8 sps:$4 sm:$0xff]  }
  0x81   : > { %570 = vmatprep.subr.bf16.mxu0 %v3023_v40  ;;  %v3077_v40 = vld [vmem:[#allocation3 + $0xd0] ss:$8 sps:$4 sm:$0xff]  }
  0x84   : > { %571 = vmatpush1.bf16.msra.mxu0 %v3025_v43  ;;  %v3085_v43 = vld [vmem:[#allocation3 + $0xf4] ss:$8 sps:$4 sm:$0xff]  }
  0x85   : > { %572 = vmatprep.subr.bf16.mxu0 %v3026_v46  ;;  %v3088_v46 = vld [vmem:[#allocation3 + $0x104] ss:$8 sps:$4 sm:$0xff]  }
  0x88   : > { %573 = vmatpush1.bf16.msra.mxu0 %v3028_v47  ;;  %v233_v47 = vpack.c.bf16 %v3612_v37, %v227_v45 }
  0x89   : > { %574 = vmatprep.subr.bf16.mxu0 %v3029_v48  ;;  %v3086_v48 = vld [vmem:[#allocation3 + $0x100] ss:$8 sps:$4 sm:$0xff]  }
  0x8c   : > { %575 = vmatpush1.bf16.msra.mxu0 %v3031_v54  ;;  %v3094_v54 = vld [vmem:[#allocation3 + $0x244] ss:$8 sps:$4 sm:$0xff]  }
  0x8d   : > { %587 = vmatprep.subr.bf16.mxu0 %v3034_v58  ;;  %v958_v58 = vrot.slane %v906_v55, 1  ;;  %v3155_v55 = vld [vmem:[#allocation6 + $0x154] ss:$8 sps:$4 sm:$0xff]  }
  0x8f   : > { %577 = vmatmul.mubr.bf16.vlgmr.msra.gmra.mrb[0].mxu0 %v333_v60  ;;  %v235_v60 = vpack.c.bf16 %v3618_v52, %v229_v57  ;;  %v960_v63 = vsel %vm954_vm2, %v958_v58, %v959_v59  ;;  %v1298_v57 = vld [vmem:[#allocation2 + $0x8] sm:$0x1]  ;;  %v3157_v59 = vld [vmem:[#allocation6 + $0x150] ss:$8 sps:$4 sm:$0xff]  }
  0x90   : > { %588 = vmatpush1.bf16.msra.mxu0 %v3032_v61  ;;  %619 = vmatprep.mubr.bf16.mxu0 %v3447_v2  ;;  %v3092_v61 = vld [vmem:[#allocation3 + $0x240] ss:$8 sps:$4 sm:$0xff]  }
  0x91   : > { %589 = vmatprep.subr.bf16.mxu0 %v3037_v0  ;;  %v3095_v0 = vld [vmem:[#allocation3 + $0x250] ss:$8 sps:$4 sm:$0xff]  }
  0x94   : > { %590 = vmatpush1.bf16.msra.mxu0 %v3035_v1  ;;  %v3098_v1 = vld [vmem:[#allocation3 + $0x260] ss:$8 sps:$4 sm:$0xff]  }
  0x95   : > { %813 = vmatprep.subr.bf16.mxu0 %v3040_v6  ;;  %v3104_v6 = vld [vmem:[#allocation3 + $0x280] ss:$8 sps:$4 sm:$0xff]  }
  0x9b   : > { %2669 = vmatmul.mubr.msk.bf16.vlgmr.msra.gmra.mrb[0].mxu0 %vm3869_vm1, %v357_v11  ;;  %v3115_v11 = vld [vmem:[#allocation3 + $0x2b4] ss:$8 sps:$4 sm:$0xff]  }
  0x9c   : > { %814 = vmatpush1.bf16.msra.mxu0 %v3038_v10  ;;  %845 = vmatprep.mubr.bf16.mxu0 %v234_v14  ;;  %v3110_v10 = vld [vmem:[#allocation3 + $0x2a0] ss:$8 sps:$4 sm:$0xff]   ;;  %v3118_v14 = vld [vmem:[#allocation3 + $0x2c4] ss:$8 sps:$4 sm:$0xff]  }
  0x9d   : > { %815 = vmatprep.subr.bf16.mxu0 %v3043_v12  ;;  %v3113_v12 = vld [vmem:[#allocation3 + $0x2b0] ss:$8 sps:$4 sm:$0xff]  }
  0xa0   : > { %816 = vmatpush1.bf16.msra.mxu0 %v3041_v15  ;;  %v3116_v15 = vld [vmem:[#allocation3 + $0x2c0] ss:$8 sps:$4 sm:$0xff]  }
  0xa1   : > { %817 = vmatprep.subr.bf16.mxu0 %v3046_v16  ;;  %v3121_v16 = vld [vmem:[#allocation3 + $0x2d4] ss:$8 sps:$4 sm:$0xff]  }
  0xa4   : > { %818 = vmatpush1.bf16.msra.mxu0 %v3044_v17  ;;  %v3119_v17 = vld [vmem:[#allocation3 + $0x2d0] ss:$8 sps:$4 sm:$0xff]  }
  0xa5   : > { %819 = vmatprep.subr.bf16.mxu0 %v3049_v18  ;;  %v3124_v18 = vld [vmem:[#allocation3 + $0x2e4] ss:$8 sps:$4 sm:$0xff]  }
  0xa8   : > { %820 = vmatpush1.bf16.msra.mxu0 %v3047_v19  ;;  %v3122_v19 = vld [vmem:[#allocation3 + $0x2e0] ss:$8 sps:$4 sm:$0xff]  }
  0xa9   : > { %821 = vmatprep.subr.bf16.mxu0 %v3052_v20  ;;  %v3127_v20 = vld [vmem:[#allocation3 + $0x2f4] ss:$8 sps:$4 sm:$0xff]  }
  0xac   : > { %822 = vmatpush1.bf16.msra.mxu0 %v3050_v21  ;;  %v3125_v21 = vld [vmem:[#allocation3 + $0x2f0] ss:$8 sps:$4 sm:$0xff]  }
  0xad   : > { %823 = vmatprep.subr.bf16.mxu0 %v3055_v22  ;;  %v3130_v22 = vld [vmem:[#allocation3 + $0x304] ss:$8 sps:$4 sm:$0xff]  }
  0xb0   : > { %824 = vmatpush1.bf16.msra.mxu0 %v3053_v23  ;;  %v3128_v23 = vld [vmem:[#allocation3 + $0x300] ss:$8 sps:$4 sm:$0xff]  }
  0xb1   : > { %825 = vmatprep.subr.bf16.mxu0 %v3058_v24  ;;  %v3133_v24 = vld [vmem:[#allocation3 + $0x314] ss:$8 sps:$4 sm:$0xff]  }
  0xb4   : > { %826 = vmatpush1.bf16.msra.mxu0 %v3056_v25  ;;  %v3131_v25 = vld [vmem:[#allocation3 + $0x310] ss:$8 sps:$4 sm:$0xff]  }
  0xb5   : > { %827 = vmatprep.subr.bf16.mxu0 %v3061_v26  ;;  %v3136_v26 = vld [vmem:[#allocation3 + $0x324] ss:$8 sps:$4 sm:$0xff]  }
  0xb8   : > { %828 = vmatpush1.bf16.msra.mxu0 %v3059_v27  ;;  %v899_v27 = vld [vmem:[%s3602_s22] sm:$0xfc] }
  0xb9   : > { %829 = vmatprep.subr.bf16.mxu0 %v3064_v28  ;;  %v902_v28 = vld [vmem:[%s3602_s22 + $0x30] sm:$0x3] }
  0xbc   : > { %830 = vmatpush1.bf16.msra.mxu0 %v3062_v29  ;;  %v3134_v29 = vld [vmem:[#allocation3 + $0x320] ss:$8 sps:$4 sm:$0xff]  }
  0xbd   : > { %831 = vmatprep.subr.bf16.mxu0 %v3067_v30  ;;  %v905_v30 = vpack.c.bf16 %v3612_v37, %v899_v27  ;;  %v3143_v37 = vld [vmem:[#allocation3 + $0x350] ss:$8 sps:$4 sm:$0xff]  }
  0xc0   : > { %832 = vmatpush1.bf16.msra.mxu0 %v3065_v31  ;;  %v908_v31 = vpack.c.bf16 %v902_v28, %v902_v28 }
  0xc1   : > { %833 = vmatprep.subr.bf16.mxu0 %v3070_v32  ;;  %v3139_v32 = vld [vmem:[#allocation3 + $0x334] ss:$8 sps:$4 sm:$0xff]  }
  0xc4   : > { %834 = vmatpush1.bf16.msra.mxu0 %v3068_v33  ;;  %v3137_v33 = vld [vmem:[#allocation3 + $0x330] ss:$8 sps:$4 sm:$0xff]  }
  0xc5   : > { %835 = vmatprep.subr.bf16.mxu0 %v3073_v34  ;;  %v955_v34 = vrot.slane %v905_v30, 1 }
  0xc8   : > { %836 = vmatpush1.bf16.msra.mxu0 %v3071_v35  ;;  %v956_v35 = vrot.slane %v908_v31, 1 }
  0xc9   : > { %837 = vmatprep.subr.bf16.mxu0 %v3076_v36  ;;  %v3142_v36 = vld [vmem:[#allocation3 + $0x344] ss:$8 sps:$4 sm:$0xff]  }
  0xcc   : > { %838 = vmatpush1.bf16.msra.mxu0 %v3074_v38  ;;  %v957_v38 = vsel %vm954_vm2, %v955_v34, %v956_v35 }
  0xcd   : > { %839 = vmatprep.subr.bf16.mxu0 %v3079_v39  ;;  %v3140_v39 = vld [vmem:[#allocation3 + $0x340] ss:$8 sps:$4 sm:$0xff]  }
  0xd0   : > { %840 = vmatpush1.bf16.msra.mxu0 %v3077_v40  ;;  %v3145_v40 = vld [vmem:[#allocation3 + $0x354] ss:$8 sps:$4 sm:$0xff]  }
  0xd1   : > { %841 = vmatprep.subr.bf16.mxu0 %v3082_v41  ;;  %v901_v41 = vld [vmem:[%s3602_s22 + $0x10] sm:$0xfc] }
  0xd4   : > { %842 = vmatpush1.bf16.msra.mxu0 %v3080_v42  ;;  %v904_v42 = vld [vmem:[%s3602_s22 + $0x40] sm:$0x3] }
  0xd5   : > { %843 = vmatprep.subr.bf16.mxu0 %v3085_v43  ;;  %v907_v43 = vpack.c.bf16 %v3618_v52, %v901_v41  ;;  %v1293_v52 = vld [vmem:[#allocation2] sm:$0x11] }
  0xd6   : > { %v1294_v58 = vsel %vm1292_vm12, 0, %v1293_v52  ;;  %vm1305_vm12 = vmor %vm1304_vm6, %vm1302_vm7  ;;  %vm1320_vm7 = vcmask 122880  }
  0xd7   : > { %v961_v45 = vrot.slane %v907_v43, 1  ;;  %1295 = vst [vmem:[#allocation2] sm:$0x11] %v1294_v58  ;;  %vm3711_vm6 = vmand %vm1320_vm7, %vm1287_vm3  ;;  %vm1345_vm7 = vsmask.f32 4368 }
  0xd8   : > { %844 = vmatpush1.bf16.msra.mxu0 %v3083_v44  ;;  %v910_v44 = vpack.c.bf16 %v904_v42, %v904_v42 }
  0xd9   : > { %856 = vmatprep.subr.bf16.mxu0 %v3088_v46 }
  0xda   : > { %v962_v46 = vrot.slane %v910_v44, 1  ;;  %v3176_v44 = vld [vmem:[#allocation6 + $0x1c4] ss:$8 sps:$4 sm:$0xff]  }
  0xdb   : > { %846 = vmatmul.mubr.bf16.vlgmr.msra.gmra.mrb[0].mxu0 %v233_v47 }
  0xdc   : > { %857 = vmatpush1.bf16.msra.mxu0 %v3086_v48  ;;  %888 = vmatprep.mubr.bf16.mxu0 %v3447_v2  ;;  %v963_v47 = vsel %vm954_vm2, %v961_v45, %v962_v46  ;;  %v3146_v48 = vld [vmem:[#allocation6 + $0x124] ss:$8 sps:$4 sm:$0xff]  }
  0xdd   : > { %858 = vmatprep.subr.bf16.mxu0 %v3091_v49  ;;  %v3148_v49 = vld [vmem:[#allocation6 + $0x120] ss:$8 sps:$4 sm:$0xff]   ;;  %1729 = vmatprep.subr.bf16.mxu1 %v3146_v48 }
  0xde   : > { %1730 = vmatpush1.bf16.msra.mxu1 %v3148_v49 }
  0xdf   : > { %1731 = vmatprep.subr.bf16.mxu1 %v3149_v50 }
  0xe0   : > { %859 = vmatpush1.bf16.msra.mxu0 %v3089_v53  ;;  %v3152_v53 = vld [vmem:[#allocation6 + $0x144] ss:$8 sps:$4 sm:$0xff]  }
  0xe1   : > { %1149 = vmatprep.subr.bf16.mxu0 %v3094_v54  ;;  %v3154_v54 = vld [vmem:[#allocation6 + $0x140] ss:$8 sps:$4 sm:$0xff]  }
  0xe2   : > { %1732 = vmatpush1.bf16.msra.mxu1 %v3151_v51 }
  0xe3   : > { %1733 = vmatprep.subr.bf16.mxu1 %v3152_v53 }
  0xe6   : > { %1734 = vmatpush1.bf16.msra.mxu1 %v3154_v54 }
  0xe7   : > { %2706 = vmatmul.mubr.msk.bf16.vlgmr.msra.gmra.mrb[0].mxu0 %vm3869_vm1, %v235_v60  ;;  %v1299_v60 = vsel %vm1297_vm15, 0, %v1298_v57  ;;  %1735 = vmatprep.subr.bf16.mxu1 %v3155_v55  ;;  %vm1385_vm15 = vcmask 1047556  }
  0xe8   : > { %1150 = vmatpush1.bf16.msra.mxu0 %v3092_v61  ;;  %1181 = vmatprep.mubr.bf16.mxu0 %v960_v63  ;;  %v1306_v61 = vld [vmem:[#allocation2 + $0x18] sm:$0x11]  ;;  %1300 = vst [vmem:[#allocation2 + $0x8] sm:$0x1] %v1299_v60  ;;  %v1310_v63 = vld [vmem:[#allocation2 + $0x20] sm:$0x1] }
  0xe9   : > { %1151 = vmatprep.subr.bf16.mxu0 %v3097_v62  ;;  %v3158_v62 = vld [vmem:[#allocation6 + $0x164] ss:$8 sps:$4 sm:$0xff]   ;;  %v3181_v60 = vld [vmem:[#allocation6 + $0x1d0] ss:$8 sps:$4 sm:$0xff]  }
  0xea   : > { %1736 = vmatpush1.bf16.msra.mxu1 %v3157_v59  ;;  %v3179_v59 = vld [vmem:[#allocation6 + $0x1d4] ss:$8 sps:$4 sm:$0xff]  }
  0xeb   : > { %1737 = vmatprep.subr.bf16.mxu1 %v3158_v62 }
  0xec   : > { %1152 = vmatpush1.bf16.msra.mxu0 %v3095_v0  ;;  %v1307_v0 = vsel %vm1305_vm12, 0, %v1306_v61 }
  0xed   : > { %1153 = vmatprep.subr.bf16.mxu0 %v3100_v13  ;;  %v3160_v13 = vld [vmem:[#allocation6 + $0x160] ss:$8 sps:$4 sm:$0xff]   ;;  %1308 = vst [vmem:[#allocation2 + $0x18] sm:$0x11] %v1307_v0  ;;  %v3182_v0 = vld [vmem:[#allocation6 + $0x1e4] ss:$8 sps:$4 sm:$0xff]  }
  0xee   : > { %1738 = vmatpush1.bf16.msra.mxu1 %v3160_v13  ;;  %v3184_v13 = vld [vmem:[#allocation6 + $0x1e0] ss:$8 sps:$4 sm:$0xff]  }
  0xf0   : > { %1154 = vmatpush1.bf16.msra.mxu0 %v3098_v1 }
  0xf1   : > { %1155 = vmatprep.subr.bf16.mxu0 %v3103_v3 }
  0xf4   : > { %1156 = vmatpush1.bf16.msra.mxu0 %v3101_v4  ;;  %v3161_v4 = vld [vmem:[#allocation6 + $0x174] ss:$8 sps:$4 sm:$0xff]  }
  0xf5   : > { %1157 = vmatprep.subr.bf16.mxu0 %v3106_v5  ;;  %1739 = vmatprep.subr.bf16.mxu1 %v3161_v4 }
  0xf8   : > { %1158 = vmatpush1.bf16.msra.mxu0 %v3104_v6  ;;  %v1315_v6 = vld [vmem:[#allocation2] sm:$0xf] }
  0xf9   : > { %1159 = vmatprep.subr.bf16.mxu0 %v3109_v7 }
  0xfc   : > { %1160 = vmatpush1.bf16.msra.mxu0 %v3107_v8  ;;  %v3163_v8 = vld [vmem:[#allocation6 + $0x170] ss:$8 sps:$4 sm:$0xff]  }
  0xfd   : > { %1161 = vmatprep.subr.bf16.mxu0 %v3112_v9  ;;  %v1316_v9 = vsel %vm3672_vm4, 0, %v1315_v6  ;;  %1740 = vmatpush1.bf16.msra.mxu1 %v3163_v8  ;;  %v3185_v8 = vld [vmem:[#allocation6 + $0x1f4] ss:$8 sps:$4 sm:$0xff]  }
  0xfe   : > { %1317 = vst [vmem:[#allocation2] sm:$0xf] %v1316_v9 }
 0x100   : > { %1162 = vmatpush1.bf16.msra.mxu0 %v3110_v10  ;;  %v1327_v10 = vld [vmem:[#allocation2 + $0x8] sm:$0xf] }
 0x101   : > { %1163 = vmatprep.subr.bf16.mxu0 %v3115_v11  ;;  %v3164_v11 = vld [vmem:[#allocation6 + $0x184] ss:$8 sps:$4 sm:$0xff]  }
 0x102   : > { %1741 = vmatprep.subr.bf16.mxu1 %v3164_v11 }
 0x104   : > { %1164 = vmatpush1.bf16.msra.mxu0 %v3113_v12  ;;  %v1328_v12 = vsel %vm1326_vm5, 0, %v1327_v10 }
 0x105   : > { %1165 = vmatprep.subr.bf16.mxu0 %v3118_v14  ;;  %1329 = vst [vmem:[#allocation2 + $0x8] sm:$0xf] %v1328_v12  ;;  %v3166_v14 = vld [vmem:[#allocation6 + $0x180] ss:$8 sps:$4 sm:$0xff]   ;;  %v3187_v12 = vld [vmem:[#allocation6 + $0x1f0] ss:$8 sps:$4 sm:$0xff]  }
 0x106   : > { %1742 = vmatpush1.bf16.msra.mxu1 %v3166_v14 }
 0x108   : > { %1166 = vmatpush1.bf16.msra.mxu0 %v3116_v15  ;;  %v3167_v15 = vld [vmem:[#allocation6 + $0x194] ss:$8 sps:$4 sm:$0xff]  }
 0x109   : > { %1167 = vmatprep.subr.bf16.mxu0 %v3121_v16  ;;  %v3169_v16 = vld [vmem:[#allocation6 + $0x190] ss:$8 sps:$4 sm:$0xff]   ;;  %1743 = vmatprep.subr.bf16.mxu1 %v3167_v15 }
 0x10a   : > { %1744 = vmatpush1.bf16.msra.mxu1 %v3169_v16 }
 0x10c   : > { %1168 = vmatpush1.bf16.msra.mxu0 %v3119_v17  ;;  %v3170_v17 = vld [vmem:[#allocation6 + $0x1a4] ss:$8 sps:$4 sm:$0xff]  }
 0x10d   : > { %1169 = vmatprep.subr.bf16.mxu0 %v3124_v18  ;;  %v3172_v18 = vld [vmem:[#allocation6 + $0x1a0] ss:$8 sps:$4 sm:$0xff]   ;;  %1745 = vmatprep.subr.bf16.mxu1 %v3170_v17  ;;  %v3188_v17 = vld [vmem:[#allocation6 + $0x204] ss:$8 sps:$4 sm:$0xff]  }
 0x10e   : > { %1746 = vmatpush1.bf16.msra.mxu1 %v3172_v18 }
 0x110   : > { %1170 = vmatpush1.bf16.msra.mxu0 %v3122_v19  ;;  %v3173_v19 = vld [vmem:[#allocation6 + $0x1b4] ss:$8 sps:$4 sm:$0xff]  }
 0x111   : > { %1171 = vmatprep.subr.bf16.mxu0 %v3127_v20  ;;  %v3175_v20 = vld [vmem:[#allocation6 + $0x1b0] ss:$8 sps:$4 sm:$0xff]   ;;  %1747 = vmatprep.subr.bf16.mxu1 %v3173_v19  ;;  %v3190_v19 = vld [vmem:[#allocation6 + $0x200] ss:$8 sps:$4 sm:$0xff]  }
 0x112   : > { %1748 = vmatpush1.bf16.msra.mxu1 %v3175_v20  ;;  %v3191_v20 = vld [vmem:[#allocation6 + $0x214] ss:$8 sps:$4 sm:$0xff]  }
 0x113   : > { %1749 = vmatprep.subr.bf16.mxu1 %v3176_v44 }
 0x114   : > { %1172 = vmatpush1.bf16.msra.mxu0 %v3125_v21  ;;  %v1241_v21 = vlaneseq }
 0x115   : > { %1173 = vmatprep.subr.bf16.mxu0 %v3130_v22 }
 0x116   : > { %v1242_v22 = vshrl.u32 %v1241_v21, 7  ;;  %v3193_v21 = vld [vmem:[#allocation6 + $0x210] ss:$8 sps:$4 sm:$0xff]  }
 0x118   : > { %1174 = vmatpush1.bf16.msra.mxu0 %v3128_v23  ;;  %v3696_v23 = vsub.s32 0, %v1242_v22 }
 0x119   : > { %1175 = vmatprep.subr.bf16.mxu0 %v3133_v24  ;;  %v1239_v24 = vld [vmem:[%s3864_s3] ss:$4 sm:$0x3] }
 0x11a   : > { %v1244_v27 = vrot.slane %v1239_v24, %v3696_v23 }
 0x11c   : > { %1176 = vmatpush1.bf16.msra.mxu0 %v3131_v25  ;;  %v3701_v25 = vsub.s32 1, %v1242_v22  ;;  %v3198_v22 = vld [vmem:[#allocation6 + $0x224] ss:$8 sps:$4 sm:$0xff]  }
 0x11d   : > { %1177 = vmatprep.subr.bf16.mxu0 %v3136_v26  ;;  %v2744_v26 = vld [vmem:[%s3864_s3 + $0x1] ss:$4 sm:$0x3] }
 0x11e   : > { %v1248_v28 = vrot.slane %v1239_v24, %v3701_v25  ;;  %v1261_v30 = vrot.slane %v2744_v26, %v3696_v23  ;;  %v1265_v35 = vrot.slane %v2744_v26, %v3701_v25  ;;  %v1391_v24 = vld [vmem:[#allocation2 + $0x8] sm:$0xf] }
 0x120   : > { %1178 = vmatpush1.bf16.msra.mxu0 %v3134_v29 }
 0x121   : > { %1179 = vmatprep.subr.bf16.mxu0 %v3139_v32  ;;  %v1322_v32 = vld [vmem:[#allocation2 + $0x18] sm:$0x1] }
 0x124   : > { %1180 = vmatpush1.bf16.msra.mxu0 %v3137_v33 }
 0x125   : > { %1192 = vmatprep.subr.bf16.mxu0 %v3142_v36  ;;  %v1323_v36 = vsel %vm3711_vm6, 0, %v1322_v32 }
 0x126   : > { %1324 = vst [vmem:[#allocation2 + $0x18] sm:$0x1] %v1323_v36 }
 0x127   : > { %1182 = vmatmul.mubr.bf16.vlgmr.msra.gmra.mrb[0].mxu0 %v957_v38 }
 0x128   : > { %1193 = vmatpush1.bf16.msra.mxu0 %v3140_v39  ;;  %1224 = vmatprep.mubr.bf16.mxu0 %v3447_v2 }
 0x129   : > { %1194 = vmatprep.subr.bf16.mxu0 %v3145_v40 }
 0x12c   : > { %1195 = vmatpush1.bf16.msra.mxu0 %v3143_v37 }
 0x133   : > { %2743 = vmatmul.mubr.msk.bf16.vlgmr.msra.gmra.mrb[0].mxu0 %vm3869_vm1, %v963_v47  ;;  %vm1309_vm1 = vmand %vm1296_vm8, %vm1301_vm11  ;;  %v3178_v47 = vld [vmem:[#allocation6 + $0x1c0] ss:$8 sps:$4 sm:$0xff]  }
 0x134   : > { %v1311_v1 = vsel %vm1309_vm1, 0, %v1310_v63  ;;  %vm3680_vm8 = vmand %vm1383_vm0, %vm1301_vm11  ;;  %1750 = vmatpush1.bf16.msra.mxu1 %v3178_v47 }
 0x135   : > { %1312 = vst [vmem:[#allocation2 + $0x20] sm:$0x1] %v1311_v1  ;;  %vm3686_vm1 = vmand %vm1385_vm15, %vm1303_vm13  ;;  %vm1332_vm13 = vcmask 254080   ;;  %1751 = vmatprep.subr.bf16.mxu1 %v3179_v59 }
 0x136   : > { %vm1387_vm11 = vmor %vm3686_vm1, %vm3680_vm8  ;;  %vm2508_vm8 = vcmask 916480  }
 0x137   : > { %vm1333_vm14 = vmand %vm1332_vm13, %vm1287_vm3 }
 0x138   : > { %1752 = vmatpush1.bf16.msra.mxu1 %v3181_v60 }
 0x139   : > { %1753 = vmatprep.subr.bf16.mxu1 %v3182_v0 }
 0x13c   : > { %v1334_v29 = vld [vmem:[#allocation2 + $0x20] sm:$0x1]  ;;  %1754 = vmatpush1.bf16.msra.mxu1 %v3184_v13 }
 0x13d   : > { %v1335_v33 = vsel %vm1333_vm14, 0, %v1334_v29  ;;  %1755 = vmatprep.subr.bf16.mxu1 %v3185_v8 }
 0x13e   : > { %1336 = vst [vmem:[#allocation2 + $0x20] sm:$0x1] %v1335_v33 }
 0x140   : > { %1756 = vmatpush1.bf16.msra.mxu1 %v3187_v12 }
 0x141   : > { %1757 = vmatprep.subr.bf16.mxu1 %v3188_v17 }
 0x144   : > { %1758 = vmatpush1.bf16.msra.mxu1 %v3190_v19 }
 0x145   : > { %1759 = vmatprep.subr.bf16.mxu1 %v3191_v20 }
 0x148   : > { %1760 = vmatpush1.bf16.msra.mxu1 %v3193_v21  ;;  %v3199_v21 = vld [vmem:[#allocation6 + $0x230] ss:$8 sps:$4 sm:$0xff]  }
 0x149   : > { %1772 = vmatprep.subr.bf16.mxu1 %v3198_v22  ;;  %v3204_v22 = vld [vmem:[#allocation6 + $0x4] ss:$8 sps:$4 sm:$0xff]  }
 0x206   : > { %v1226_v34 = vpop.f32.mrb[0].mxu0 }
 0x207   : > { %v1251_v38 = vmul.f32 %v1244_v27, %v1226_v34  ;;  %v1228_v39 = vpop.f32.mrb[1].mxu0 }
 0x208   : > { %v1252_v40 = vmul.f32 %v1248_v28, %v1228_v39  ;;  %v1230_v41 = vpop.f32.mrb[2].mxu0 }
 0x209   : > { %v1268_v42 = vadd.f32 %v1261_v30, %v1251_v38  ;;  %v1253_v37 = vmul.f32 %v1244_v27, %v1230_v41  ;;  %v1232_v43 = vpop.f32.mrb[3].mxu0 }
 0x20a   : > { %v1269_v45 = vadd.f32 %v1265_v35, %v1252_v40  ;;  %v1254_v46 = vmul.f32 %v1248_v28, %v1232_v43  ;;  %v1388_v28 = vld [vmem:[#allocation2] sm:$0xff] }
 0x20b   : > { %vm1272_vm12 = vcmp.gt.f32.partialorder %v1268_v42, 0.0  ;;  %v1276_v48 = vmul.f32 0.02, %v1268_v42  ;;  %v1270_v49 = vadd.f32 %v1261_v30, %v1253_v37  ;;  %v1405_v30 = vld [vmem:[#allocation2 + $0x20] sm:$0x1] }
 0x20c   : > { %vm1273_vm5 = vcmp.gt.f32.partialorder %v1269_v45, 0.0  ;;  %v1277_v50 = vmul.f32 0.02, %v1269_v45  ;;  %v1271_v51 = vadd.f32 %v1265_v35, %v1254_v46  ;;  %v1402_v35 = vld [vmem:[#allocation2 + $0x18] sm:$0x11] }
 0x20d   : > { %vm1274_vm13 = vcmp.gt.f32.partialorder %v1270_v49, 0.0  ;;  %v1278_v53 = vmul.f32 0.02, %v1270_v49  ;;  %v1280_v54 = vsel %vm1272_vm12, %v1268_v42, %v1276_v48  ;;  %vm1346_vm12 = vmor %vm1287_vm3, %vm1345_vm7 }
 0x20e   : > { %vm1275_vm14 = vcmp.gt.f32.partialorder %v1271_v51, 0.0  ;;  %v1279_v52 = vmul.f32 0.02, %v1271_v51  ;;  %v1281_v55 = vsel %vm1273_vm5, %v1269_v45, %v1277_v50  ;;  %vm1399_vm5 = vcmask 1040512  }
 0x20f   : > { %v2874_v57 = vpack.c.bf16 %v1281_v55, %v1280_v54  ;;  %v1282_v58 = vsel %vm1274_vm13, %v1270_v49, %v1278_v53  ;;  %vm1373_vm13 = vcmask 130048  }
 0x210   : > { %v1283_v61 = vsel %vm1275_vm14, %v1271_v51, %v1279_v52  ;;  %vm3723_vm14 = vmand %vm1399_vm5, %vm1287_vm3 }
 0x211   : > { %v1348_v62 = vshrl.u32 %v2874_v57, 16  ;;  %v2875_v63 = vpack.c.bf16 %v1283_v61, %v1282_v58  ;;  %v1351_v4 = vshll.u32 %v2874_v57, 16  ;;  %vm1401_vm7 = vmor %vm3652_vm10, %vm3723_vm14 }
 0x212   : > { %vm1396_vm3 = vmor %vm1385_vm15, %vm1383_vm0  ;;  %vm3892_vm0 = vsmask.f32 7424 }
 0x213   : > { %v1350_v1 = vrot.slane %v1348_v62, 7  ;;  %v1356_v6 = vshrl.u32 %v2875_v63, 16  ;;  %v1359_v11 = vshll.u32 %v2875_v63, 16  ;;  %vm3894_vm10 = vmmov %vm3892_vm0 }
 0x215   : > { %v1353_v9 = vor.u32 %v1351_v4, %v1350_v1  ;;  %v1358_v10 = vrot.slane %v1356_v6, 7  ;;  %v1354_v14 = vrot.slane %v1350_v1, 4 }
 0x217   : > { %1364 = vrot.lane.b32.xlu0 %v1353_v9, %s3448_s8  ;;  %v1363_v15 = vrot.slane %v1358_v10, 4  ;;  %v1361_v16 = vor.u32 %v1359_v11, %v1358_v10  ;;  %v3196_v11 = vld [vmem:[#allocation6 + $0x220] ss:$8 sps:$4 sm:$0xff]  }
 0x219   : > { %1368 = vrot.lane.b32.xlu1 %v1363_v15, %s3448_s8  ;;  %v1362_v18 = vsel %vm1346_vm12, %v1354_v14, %v1361_v16 }
 0x21b   : > { %1366 = vrot.lane.b32.xlu0 %v1362_v18, %s3448_s8  ;;  %v3201_v18 = vld [vmem:[#allocation6 + $0x234] ss:$8 sps:$4 sm:$0xff]  }
 0x289   : > { %v1365_v26 = vpop.permute.xlu0 %1364 }
 0x28a   : > { %v1370_v29 = vrot.slane %v1365_v26, 4 }
 0x28b   : > { %v1369_v32 = vpop.permute.xlu1 %1368 }
 0x28c   : > { %v1374_v33 = vsel %vm1373_vm13, %v1370_v29, %v1365_v26  ;;  %v1392_v34 = vsel %vm3672_vm4, %v1370_v29, %v1391_v24  ;;  %v1372_v36 = vrot.slane %v1369_v32, 4  ;;  %v3202_v29 = vld [vmem:[#allocation6] ss:$8 sps:$4 sm:$0xff]   ;;  %vm3895_vm4 = vcmask 261120  }
 0x28d   : > { %v1389_v38 = vsel %vm1387_vm11, %v1374_v33, %v1388_v28  ;;  %1393 = vst [vmem:[#allocation2 + $0x8] sm:$0xf] %v1392_v34  ;;  %v1367_v39 = vpop.permute.xlu0 %1366  ;;  %v3207_v34 = vld [vmem:[#allocation6 + $0x10] ss:$8 sps:$4 sm:$0xff]  }
 0x28e   : > { %1390 = vst [vmem:[#allocation2] sm:$0xff] %v1389_v38  ;;  %v1376_v3 = vsel %vm1373_vm13, %v1372_v36, %v1369_v32  ;;  %v1406_v56 = vsel %vm3711_vm6, %v1372_v36, %v1405_v30  ;;  %v1371_v40 = vrot.slane %v1367_v39, 4  ;;  %v3209_v32 = vld [vmem:[#allocation6 + $0x14] ss:$8 sps:$4 sm:$0xff]   ;;  %v3210_v36 = vld [vmem:[#allocation6 + $0x20] ss:$8 sps:$4 sm:$0xff]  }
 0x28f   : > { %v1403_v41 = vsel %vm1401_vm7, %v1376_v3, %v1402_v35  ;;  %1407 = vst [vmem:[#allocation2 + $0x20] sm:$0x1] %v1406_v56  ;;  %v3212_v35 = vld [vmem:[#allocation6 + $0x24] ss:$8 sps:$4 sm:$0xff]   ;;  %v3216_v56 = vld [vmem:[#allocation6 + $0x40] ss:$8 sps:$4 sm:$0xff]  }
 0x290   : > { %1404 = vst [vmem:[#allocation2 + $0x18] sm:$0x11] %v1403_v41  ;;  %v1375_v7 = vsel %vm1373_vm13, %v1371_v40, %v1367_v39  ;;  %1398 = vst.msk [vmem:[#allocation2 + $0x14] sm:$0xf] %vm1313_vm9, %v1371_v40  ;;  %v3213_v39 = vld [vmem:[#allocation6 + $0x30] ss:$8 sps:$4 sm:$0xff]  }
 0x291   : > { %1397 = vst.msk [vmem:[#allocation2 + $0xc] sm:$0xff] %vm1396_vm3, %v1375_v7  ;;  %vm3893_vm9 = vmmov %vm3892_vm0  ;;  %v3218_v3 = vld [vmem:[#allocation6 + $0x44] ss:$8 sps:$4 sm:$0xff]   ;;  %v3221_v40 = vld [vmem:[#allocation6 + $0x54] ss:$8 sps:$4 sm:$0xff]  }
 0x292   : > { %v3219_v41 = vld [vmem:[#allocation6 + $0x50] ss:$8 sps:$4 sm:$0xff]   ;;  %v3224_v7 = vld [vmem:[#allocation6 + $0x64] ss:$8 sps:$4 sm:$0xff]  }
 0x294   : > { %v1409_v54 = vld [vmem:[#allocation2 + $0x8] sm:$0xf] }
 0x295   : > { %v2085_v44 = vld [vmem:[#allocation2] sm:$0xee]  ;;  %v2086_v63 = vld [vmem:[#allocation2 + $0x8] sm:$0xe] }
 0x296   : > { %v3206_v58 = vld [vmem:[#allocation2 + $0x20] ss:$0 sps:$4 sm:$0x11]  }
 0x297   : > { %v1448_v5 = vld [vmem:[#allocation2 + $0x18] sm:$0x11]  ;;  %v1411_v47 = vld [vmem:[#allocation2 + $0x14] sm:$0xf]  ;;  %v2139_v15 = vrot.slane %v3206_v58, 1  ;;  %v1540_v27 = vshll.u32 %v3206_v58, 16 }
 0x298   : > { %v1410_v42 = vld [vmem:[#allocation2 + $0xc] sm:$0xff]  ;;  %v2751_v37 = vcombine.high %v1448_v5, %v1448_v5  ;;  %v2750_v43 = vcombine.low %v1448_v5, %v1448_v5  ;;  %v3750_v57 = vcombine.low %v1409_v54, %v1411_v47  ;;  %v2829_v4 = vcombine.low %v2086_v63, %v1411_v47  ;;  %v2463_v47 = vld [vmem:[%s3602_s22 + $0x8] sm:$0xfe] }
 0x299   : > { %v2748_v45 = vcombine.high %v1389_v38, %v1410_v42  ;;  %v3746_v46 = vcombine.low %v1389_v38, %v1410_v42  ;;  %v2828_v31 = vcombine.high %v2085_v44, %v1410_v42  ;;  %v2827_v49 = vcombine.low %v2085_v44, %v1410_v42  ;;  %v3215_v38 = vld [vmem:[#allocation6 + $0x34] ss:$8 sps:$4 sm:$0xff]   ;;  %v3222_v5 = vld [vmem:[#allocation6 + $0x60] ss:$8 sps:$4 sm:$0xff]   ;;  %v2462_v44 = vld [vmem:[%s3602_s22] sm:$0xfe] }
 0x29a   : > { %v1528_v48 = vshll.u32 %v2751_v37, 16  ;;  %v1516_v53 = vshll.u32 %v2750_v43, 16  ;;  %v2136_v62 = vrot.slane %v2751_v37, 1  ;;  %v2133_v1 = vrot.slane %v2750_v43, 1  ;;  %v3227_v42 = vld [vmem:[#allocation6 + $0x74] ss:$8 sps:$4 sm:$0xff]  }
 0x29b   : > { %v1523_v50 = vshll.u32 %v2748_v45, 16  ;;  %v1511_v51 = vshll.u32 %v3746_v46, 16  ;;  %v1521_v52 = vshrl.u32 %v2748_v45, 16  ;;  %v1509_v55 = vshrl.u32 %v3746_v46, 16  ;;  %v3225_v37 = vld [vmem:[#allocation6 + $0x70] ss:$8 sps:$4 sm:$0xff]  }
 0x29c   : > { %v2135_v61 = vrot.slane %v2828_v31, 1  ;;  %v1530_v0 = vrot.slane %v1528_v48, 1  ;;  %v2132_v13 = vrot.slane %v2827_v49, 1  ;;  %v1518_v9 = vrot.slane %v1516_v53, 1  ;;  %v3230_v43 = vld [vmem:[#allocation6 + $0x84] ss:$8 sps:$4 sm:$0xff]  }
 0x29d   : > { %v1525_v59 = vrot.slane %v1523_v50, 1  ;;  %v1513_v60 = vrot.slane %v1511_v51, 1  ;;  %v2138_v14 = vrot.slane %v2829_v4, 1  ;;  %v1535_v19 = vshll.u32 %v3750_v57, 16  ;;  %v2466_v49 = vld [vmem:[%s3602_s22 + $0x20] sm:$0xff]  ;;  %v2467_v54 = vld [vmem:[%s3602_s22 + $0x28] sm:$0xff] }
 0x29e   : > { %v3753_v10 = vsel %vm954_vm2, %v2135_v61, %v2136_v62  ;;  %v3756_v12 = vsel %vm954_vm2, %v2132_v13, %v2133_v1  ;;  %v1533_v26 = vshrl.u32 %v3750_v57, 16  ;;  %v1542_v30 = vrot.slane %v1540_v27, 1  ;;  %v2464_v51 = vld [vmem:[%s3602_s22 + $0x10] sm:$0xfe]  ;;  %v2469_v61 = vld [vmem:[%s3602_s22 + $0x38] sm:$0x1] }
 0x29f   : > { %v1526_v6 = vor.u32 %v1525_v59, %v1521_v52  ;;  %v1514_v8 = vor.u32 %v1513_v60, %v1509_v55  ;;  %v3762_v20 = vsel %vm954_vm2, %v2138_v14, %v2139_v15  ;;  %v1537_v24 = vrot.slane %v1535_v19, 1  ;;  %v2468_v55 = vld [vmem:[%s3602_s22 + $0x30] sm:$0x1]  ;;  %v2470_v62 = vld [vmem:[%s3602_s22 + $0x40] sm:$0x1] }
 0x2a0   : > { %v2481_v31 = vrot.slane %v2462_v44, 1  ;;  %v2484_v50 = vrot.slane %v2463_v47, 1  ;;  %v2485_v53 = vrot.slane %v2466_v49, 1  ;;  %v2487_v52 = vrot.slane %v2464_v51, 1  ;;  %v3233_v4 = vld [vmem:[#allocation6 + $0x94] ss:$8 sps:$4 sm:$0xff]  }
 0x2a1   : > { %v1531_v16 = vsel %vm3892_vm0, %v1526_v6, %v1530_v0  ;;  %v1519_v17 = vsel %vm3893_vm9, %v1514_v8, %v1518_v9  ;;  %v1538_v28 = vor.u32 %v1537_v24, %v1533_v26  ;;  %v2488_v59 = vrot.slane %v2467_v54, 1  ;;  %v3228_v0 = vld [vmem:[#allocation6 + $0x80] ss:$8 sps:$4 sm:$0xff]   ;;  %v3231_v9 = vld [vmem:[#allocation6 + $0x90] ss:$8 sps:$4 sm:$0xff]  }
 0x2a2   : > { %1761 = vmatprep.mubr.bf16.mxu1 %v1531_v16  ;;  %v2490_v60 = vrot.slane %v2468_v55, 1  ;;  %v2486_v63 = vsel %vm954_vm2, %v2484_v50, %v2485_v53  ;;  %v2492_v1 = vrot.slane %v2469_v61, 1  ;;  %v2494_v8 = vrot.slane %v2470_v62, 1  ;;  %v3236_v14 = vld [vmem:[#allocation6 + $0xa4] ss:$8 sps:$4 sm:$0xff]  }
 0x2a3   : > { %1762 = vmatmul.mubr.bf16.vlgmr.msra.gmra.mrb[0].mxu1 %v1519_v17  ;;  %v1543_v33 = vsel %vm3894_vm10, %v1538_v28, %v1542_v30  ;;  %2498 = vrot.lane.b32.xlu0 %v2486_v63, %s3449_s9  ;;  %v2489_v13 = vsel %vm954_vm2, %v2487_v52, %v2488_v59  ;;  %v3234_v16 = vld [vmem:[#allocation6 + $0xa0] ss:$8 sps:$4 sm:$0xff]   ;;  %v3239_v17 = vld [vmem:[#allocation6 + $0xb4] ss:$8 sps:$4 sm:$0xff]   ;;  %v3242_v19 = vld [vmem:[#allocation6 + $0xc4] ss:$8 sps:$4 sm:$0xff]  }
 0x2a4   : > { %1773 = vmatpush1.bf16.msra.mxu1 %v3196_v11  ;;  %1804 = vmatprep.mubr.bf16.mxu1 %v3447_v2  ;;  %v2493_v11 = vsel %vm954_vm2, %v2485_v53, %v2492_v1  ;;  %v2495_v15 = vsel %vm954_vm2, %v2488_v59, %v2494_v8  ;;  %v3243_v24 = vld [vmem:[#allocation6 + $0xd0] ss:$8 sps:$4 sm:$0xff]   ;;  %v3248_v26 = vld [vmem:[#allocation6 + $0xe4] ss:$8 sps:$4 sm:$0xff]   ;;  %v3246_v27 = vld [vmem:[#allocation6 + $0xe0] ss:$8 sps:$4 sm:$0xff]  }
 0x2a5   : > { %1774 = vmatprep.subr.bf16.mxu1 %v3201_v18  ;;  %v3237_v18 = vld [vmem:[#allocation6 + $0xb0] ss:$8 sps:$4 sm:$0xff]   ;;  %v3251_v28 = vld [vmem:[#allocation6 + $0xf4] ss:$8 sps:$4 sm:$0xff]   ;;  %v3254_v30 = vld [vmem:[#allocation6 + $0x104] ss:$8 sps:$4 sm:$0xff]  }
 0x2a6   : > { %v3285_v44 = vld [vmem:[#allocation6 + $0x2c4] ss:$8 sps:$4 sm:$0xff]   ;;  %v3288_v47 = vld [vmem:[#allocation6 + $0x2d4] ss:$8 sps:$4 sm:$0xff]   ;;  %v3289_v49 = vld [vmem:[#allocation6 + $0x2e0] ss:$8 sps:$4 sm:$0xff]  }
 0x2a7   : > { %v3294_v50 = vld [vmem:[#allocation6 + $0x2f4] ss:$8 sps:$4 sm:$0xff]   ;;  %v3292_v51 = vld [vmem:[#allocation6 + $0x2f0] ss:$8 sps:$4 sm:$0xff]   ;;  %v3297_v53 = vld [vmem:[#allocation6 + $0x304] ss:$8 sps:$4 sm:$0xff]  }
 0x2a8   : > { %1775 = vmatpush1.bf16.msra.mxu1 %v3199_v21  ;;  %v3240_v21 = vld [vmem:[#allocation6 + $0xc0] ss:$8 sps:$4 sm:$0xff]   ;;  %v3300_v52 = vld [vmem:[#allocation6 + $0x314] ss:$8 sps:$4 sm:$0xff]   ;;  %v3298_v55 = vld [vmem:[#allocation6 + $0x310] ss:$8 sps:$4 sm:$0xff]  }
 0x2a9   : > { %1999 = vmatprep.subr.bf16.mxu1 %v3204_v22  ;;  %v3245_v22 = vld [vmem:[#allocation6 + $0xd4] ss:$8 sps:$4 sm:$0xff]   ;;  %v3295_v54 = vld [vmem:[#allocation6 + $0x300] ss:$8 sps:$4 sm:$0xff]   ;;  %v3304_v61 = vld [vmem:[#allocation6 + $0x330] ss:$8 sps:$4 sm:$0xff]  }
 0x2aa   : > { %v3301_v59 = vld [vmem:[#allocation6 + $0x320] ss:$8 sps:$4 sm:$0xff]   ;;  %v3310_v62 = vld [vmem:[#allocation6 + $0x344] ss:$8 sps:$4 sm:$0xff]  }
 0x2ab   : > { %v3308_v63 = vld [vmem:[#allocation6 + $0x340] ss:$8 sps:$4 sm:$0xff]  }
 0x2af   : > { %2789 = vmatmul.mubr.msk.bf16.vlgmr.msra.gmra.mrb[0].mxu1 %vm3895_vm4, %v1543_v33  ;;  %v3257_v33 = vld [vmem:[#allocation6 + $0x114] ss:$8 sps:$4 sm:$0xff]  }
 0x2b0   : > { %2000 = vmatpush1.bf16.msra.mxu1 %v3202_v29  ;;  %2031 = vmatprep.mubr.bf16.mxu1 %v2748_v45  ;;  %v2465_v45 = vld [vmem:[%s3602_s22 + $0x18] sm:$0xff]  ;;  %v3249_v29 = vld [vmem:[#allocation6 + $0xf0] ss:$8 sps:$4 sm:$0xff]  }
 0x2b1   : > { %2001 = vmatprep.subr.bf16.mxu1 %v3209_v32  ;;  %v2482_v48 = vrot.slane %v2465_v45, 1  ;;  %v3252_v32 = vld [vmem:[#allocation6 + $0x100] ss:$8 sps:$4 sm:$0xff]  }
 0x2b2   : > { %v3283_v45 = vld [vmem:[#allocation6 + $0x2c0] ss:$8 sps:$4 sm:$0xff]  }
 0x2b3   : > { %v2483_v58 = vsel %vm954_vm2, %v2481_v31, %v2482_v48  ;;  %v2491_v6 = vsel %vm954_vm2, %v2482_v48, %v2490_v60  ;;  %vm3896_vm2 = vmmov %vm3895_vm4  ;;  %v3286_v31 = vld [vmem:[#allocation6 + $0x2d0] ss:$8 sps:$4 sm:$0xff]   ;;  %v3291_v48 = vld [vmem:[#allocation6 + $0x2e4] ss:$8 sps:$4 sm:$0xff]  }
 0x2b4   : > { %2002 = vmatpush1.bf16.msra.mxu1 %v3207_v34  ;;  %2496 = vrot.lane.b32.xlu1 %v2483_v58, %s3449_s9  ;;  %v3255_v34 = vld [vmem:[#allocation6 + $0x110] ss:$8 sps:$4 sm:$0xff]   ;;  %v3303_v58 = vld [vmem:[#allocation6 + $0x324] ss:$8 sps:$4 sm:$0xff]   ;;  %v3306_v60 = vld [vmem:[#allocation6 + $0x334] ss:$8 sps:$4 sm:$0xff]  }
 0x2b5   : > { %2003 = vmatprep.subr.bf16.mxu1 %v3212_v35  ;;  %2502 = vrot.lane.b32.xlu0 %v2491_v6, %s3449_s9  ;;  %v3260_v35 = vld [vmem:[#allocation6 + $0x244] ss:$8 sps:$4 sm:$0xff]   ;;  %vm3897_vm15 = vmmov %vm3896_vm2 }
 0x2b6   : > { %v2867_v6 = vld [vmem:[%s3864_s3 + $0x2] ss:$4 sm:$0x3] }
 0x2b7   : > { %v2422_v8 = vrot.slane %v2867_v6, %v3696_v23 }
 0x2b8   : > { %2004 = vmatpush1.bf16.msra.mxu1 %v3210_v36  ;;  %2500 = vrot.lane.b32.xlu1 %v2489_v13, %s3449_s9  ;;  %v3258_v36 = vld [vmem:[#allocation6 + $0x240] ss:$8 sps:$4 sm:$0xff]   ;;  %v3311_v13 = vld [vmem:[#allocation6 + $0x350] ss:$8 sps:$4 sm:$0xff]  }
 0x2b9   : > { %2005 = vmatprep.subr.bf16.mxu1 %v3215_v38  ;;  %2506 = vrot.lane.b32.xlu0 %v2495_v15, %s3449_s9  ;;  %v3264_v38 = vld [vmem:[#allocation6 + $0x254] ss:$8 sps:$4 sm:$0xff]  }
 0x2bc   : > { %2006 = vmatpush1.bf16.msra.mxu1 %v3213_v39  ;;  %2504 = vrot.lane.b32.xlu1 %v2493_v11, %s3449_s9  ;;  %v3262_v39 = vld [vmem:[#allocation6 + $0x250] ss:$8 sps:$4 sm:$0xff]   ;;  %s3377_s9 = scalar_lea.vmem %s3376_s7, 1024 }
 0x2bd   : > { %2007 = vmatprep.subr.bf16.mxu1 %v3218_v3  ;;  %v3267_v3 = vld [vmem:[#allocation6 + $0x264] ss:$8 sps:$4 sm:$0xff]   ;;  %p3379_p7 = scmp.lt.s32.totalorder %s3377_s9, %s3371_s28 }
 0x2bf   : > { %p3380_p8 = por %p3379_p7, %p3378_p4 }
 0x2c0   : > { %2008 = vmatpush1.bf16.msra.mxu1 %v3216_v56  ;;  %v3270_v56 = vld [vmem:[#allocation6 + $0x274] ss:$8 sps:$4 sm:$0xff]  }
 0x2c1   : > { %2009 = vmatprep.subr.bf16.mxu1 %v3221_v40  ;;  %v3268_v40 = vld [vmem:[#allocation6 + $0x270] ss:$8 sps:$4 sm:$0xff]   ;;  %p3381_p11 = pnand %p3380_p8, %p3374_p3 }
 0x2c4   : > { %2010 = vmatpush1.bf16.msra.mxu1 %v3219_v41  ;;  %v3273_v41 = vld [vmem:[#allocation6 + $0x284] ss:$8 sps:$4 sm:$0xff]  }
 0x2c5   : > { %2011 = vmatprep.subr.bf16.mxu1 %v3224_v7  ;;  %v3271_v7 = vld [vmem:[#allocation6 + $0x280] ss:$8 sps:$4 sm:$0xff]  }
 0x2c8   : > { %2012 = vmatpush1.bf16.msra.mxu1 %v3222_v5  ;;  %v3276_v5 = vld [vmem:[#allocation6 + $0x294] ss:$8 sps:$4 sm:$0xff]  }
 0x2c9   : > { %2013 = vmatprep.subr.bf16.mxu1 %v3227_v42  ;;  %v3279_v42 = vld [vmem:[#allocation6 + $0x2a4] ss:$8 sps:$4 sm:$0xff]  }
 0x2cc   : > { %2014 = vmatpush1.bf16.msra.mxu1 %v3225_v37  ;;  %v3282_v37 = vld [vmem:[#allocation6 + $0x2b4] ss:$8 sps:$4 sm:$0xff]  }
 0x2cd   : > { %2015 = vmatprep.subr.bf16.mxu1 %v3230_v43  ;;  %v3280_v43 = vld [vmem:[#allocation6 + $0x2b0] ss:$8 sps:$4 sm:$0xff]  }
 0x2d0   : > { %2016 = vmatpush1.bf16.msra.mxu1 %v3228_v0  ;;  %v3313_v0 = vld [vmem:[#allocation6 + $0x354] ss:$8 sps:$4 sm:$0xff]  }
 0x2d1   : > { %2017 = vmatprep.subr.bf16.mxu1 %v3233_v4 }
 0x2d4   : > { %2018 = vmatpush1.bf16.msra.mxu1 %v3231_v9 }
 0x2d5   : > { %2019 = vmatprep.subr.bf16.mxu1 %v3236_v14 }
 0x2d8   : > { %2020 = vmatpush1.bf16.msra.mxu1 %v3234_v16 }
 0x2d9   : > { %2021 = vmatprep.subr.bf16.mxu1 %v3239_v17 }
 0x2dc   : > { %2022 = vmatpush1.bf16.msra.mxu1 %v3237_v18 }
 0x2dd   : > { %2023 = vmatprep.subr.bf16.mxu1 %v3242_v19 }
 0x2e0   : > { %2024 = vmatpush1.bf16.msra.mxu1 %v3240_v21 }
 0x2e1   : > { %2025 = vmatprep.subr.bf16.mxu1 %v3245_v22 }
 0x2e4   : > { %2026 = vmatpush1.bf16.msra.mxu1 %v3243_v24 }
 0x2e5   : > { %2027 = vmatprep.subr.bf16.mxu1 %v3248_v26 }
 0x2e8   : > { %2028 = vmatpush1.bf16.msra.mxu1 %v3246_v27 }
 0x2e9   : > { %2029 = vmatprep.subr.bf16.mxu1 %v3251_v28 }
 0x2ec   : > { %2030 = vmatpush1.bf16.msra.mxu1 %v3249_v29 }
 0x2ed   : > { %2042 = vmatprep.subr.bf16.mxu1 %v3254_v30 }
 0x2ef   : > { %2032 = vmatmul.mubr.bf16.vlgmr.msra.gmra.mrb[0].mxu1 %v3746_v46  ;;  %v3265_v46 = vld [vmem:[#allocation6 + $0x260] ss:$8 sps:$4 sm:$0xff]  }
 0x2f0   : > { %2043 = vmatpush1.bf16.msra.mxu1 %v3252_v32  ;;  %2074 = vmatprep.mubr.bf16.mxu1 %v3447_v2 }
 0x2f1   : > { %2044 = vmatprep.subr.bf16.mxu1 %v3257_v33 }
 0x2f4   : > { %2045 = vmatpush1.bf16.msra.mxu1 %v3255_v34 }
 0x2f5   : > { %2326 = vmatprep.subr.bf16.mxu1 %v3260_v35 }
 0x2fb   : > { %2826 = vmatmul.mubr.msk.bf16.vlgmr.msra.gmra.mrb[0].mxu1 %vm3896_vm2, %v3750_v57  ;;  %v3274_v57 = vld [vmem:[#allocation6 + $0x290] ss:$8 sps:$4 sm:$0xff]  }
 0x2fc   : > { %2327 = vmatpush1.bf16.msra.mxu1 %v3258_v36  ;;  %2358 = vmatprep.mubr.bf16.mxu1 %v3753_v10  ;;  %v3277_v10 = vld [vmem:[#allocation6 + $0x2a0] ss:$8 sps:$4 sm:$0xff]  }
 0x2fd   : > { %2328 = vmatprep.subr.bf16.mxu1 %v3264_v38 }
 0x300   : > { %2329 = vmatpush1.bf16.msra.mxu1 %v3262_v39 }
 0x301   : > { %2330 = vmatprep.subr.bf16.mxu1 %v3267_v3 }
 0x304   : > { %2331 = vmatpush1.bf16.msra.mxu1 %v3265_v46 }
 0x305   : > { %2332 = vmatprep.subr.bf16.mxu1 %v3270_v56 }
 0x308   : > { %2333 = vmatpush1.bf16.msra.mxu1 %v3268_v40 }
 0x309   : > { %2334 = vmatprep.subr.bf16.mxu1 %v3273_v41 }
 0x30c   : > { %2335 = vmatpush1.bf16.msra.mxu1 %v3271_v7 }
 0x30d   : > { %2336 = vmatprep.subr.bf16.mxu1 %v3276_v5 }
 0x310   : > { %2337 = vmatpush1.bf16.msra.mxu1 %v3274_v57 }
 0x311   : > { %2338 = vmatprep.subr.bf16.mxu1 %v3279_v42 }
 0x314   : > { %2339 = vmatpush1.bf16.msra.mxu1 %v3277_v10 }
 0x315   : > { %2340 = vmatprep.subr.bf16.mxu1 %v3282_v37  ;;  %v2499_v1 = vpop.permute.xlu0 %2498 }
 0x318   : > { %2341 = vmatpush1.bf16.msra.mxu1 %v3280_v43 }
 0x319   : > { %2342 = vmatprep.subr.bf16.mxu1 %v3285_v44 }
 0x31c   : > { %2343 = vmatpush1.bf16.msra.mxu1 %v3283_v45 }
 0x31d   : > { %2344 = vmatprep.subr.bf16.mxu1 %v3288_v47 }
 0x320   : > { %2345 = vmatpush1.bf16.msra.mxu1 %v3286_v31 }
 0x321   : > { %2346 = vmatprep.subr.bf16.mxu1 %v3291_v48 }
 0x324   : > { %2347 = vmatpush1.bf16.msra.mxu1 %v3289_v49 }
 0x325   : > { %2348 = vmatprep.subr.bf16.mxu1 %v3294_v50 }
 0x326   : > { %v2497_v4 = vpop.permute.xlu1 %2496 }
 0x327   : > { %v2503_v9 = vpop.permute.xlu0 %2502 }
 0x328   : > { %2349 = vmatpush1.bf16.msra.mxu1 %v3292_v51 }
 0x329   : > { %2350 = vmatprep.subr.bf16.mxu1 %v3297_v53 }
 0x32a   : > { %v2501_v15 = vpop.permute.xlu1 %2500 }
 0x32b   : > { %v2507_v28 = vpop.permute.xlu0 %2506  ;;  %v2510_v32 = vsel %vm2508_vm8, %v2499_v1, %v2501_v15 }
 0x32c   : > { %2351 = vmatpush1.bf16.msra.mxu1 %v3295_v54 }
 0x32d   : > { %2352 = vmatprep.subr.bf16.mxu1 %v3300_v52 }
 0x32e   : > { %v2505_v34 = vpop.permute.xlu1 %2504 }
 0x32f   : > { %v2512_v38 = vsel %vm2508_vm8, %v2505_v34, %v2507_v28  ;;  %v2511_v41 = vsel %vm2508_vm8, %v2503_v9, %v2505_v34 }
 0x330   : > { %2353 = vmatpush1.bf16.msra.mxu1 %v3298_v55 }
 0x331   : > { %2354 = vmatprep.subr.bf16.mxu1 %v3303_v58 }
 0x334   : > { %2355 = vmatpush1.bf16.msra.mxu1 %v3301_v59 }
 0x335   : > { %2356 = vmatprep.subr.bf16.mxu1 %v3306_v60 }
 0x338   : > { %2357 = vmatpush1.bf16.msra.mxu1 %v3304_v61 }
 0x339   : > { %2369 = vmatprep.subr.bf16.mxu1 %v3310_v62 }
 0x33b   : > { %2359 = vmatmul.mubr.bf16.vlgmr.msra.gmra.mrb[0].mxu1 %v3756_v12  ;;  %v2868_v12 = vld [vmem:[%s3864_s3 + $0x3] ss:$4 sm:$0x3] }
 0x33c   : > { %2370 = vmatpush1.bf16.msra.mxu1 %v3308_v63  ;;  %2401 = vmatprep.mubr.bf16.mxu1 %v3447_v2  ;;  %v2426_v2 = vrot.slane %v2867_v6, %v3701_v25  ;;  %v2439_v11 = vrot.slane %v2868_v12, %v3696_v23  ;;  %v2509_v23 = vsel %vm2508_vm8, %v2497_v4, %v2499_v1 }
 0x33d   : > { %2371 = vmatprep.subr.bf16.mxu1 %v3313_v0 }
 0x340   : > { %2372 = vmatpush1.bf16.msra.mxu1 %v3311_v13 }
 0x347   : > { %2866 = vmatmul.mubr.msk.bf16.vlgmr.msra.gmra.mrb[0].mxu1 %vm3897_vm15, %v3762_v20  ;;  %v2443_v20 = vrot.slane %v2868_v12, %v3701_v25 }
 0x41a   : > { %v2403_v14 = vpop.f32.mrb[0].mxu1 }
 0x41b   : > { %v2429_v16 = vmul.f32 %v2422_v8, %v2403_v14  ;;  %v2405_v17 = vpop.f32.mrb[1].mxu1 }
 0x41c   : > { %v2430_v18 = vmul.f32 %v2426_v2, %v2405_v17  ;;  %v2407_v19 = vpop.f32.mrb[2].mxu1 }
 0x41d   : > { %v2446_v21 = vadd.f32 %v2439_v11, %v2429_v16  ;;  %v2431_v22 = vmul.f32 %v2422_v8, %v2407_v19  ;;  %v2409_v24 = vpop.f32.mrb[3].mxu1 }
 0x41e   : > { %v2447_v26 = vadd.f32 %v2443_v20, %v2430_v18  ;;  %v2432_v27 = vmul.f32 %v2426_v2, %v2409_v24 }
 0x41f   : > { %v2454_v29 = vmul.f32 0.02, %v2446_v21  ;;  %vm2450_vm1 = vcmp.gt.f32.partialorder %v2446_v21, 0.0  ;;  %v2448_v25 = vadd.f32 %v2439_v11, %v2431_v22 }
 0x420   : > { %v2455_v30 = vmul.f32 0.02, %v2447_v26  ;;  %vm2451_vm11 = vcmp.gt.f32.partialorder %v2447_v26, 0.0  ;;  %v2449_v33 = vadd.f32 %v2443_v20, %v2432_v27 }
 0x421   : > { %v2458_v35 = vsel %vm2450_vm1, %v2446_v21, %v2454_v29  ;;  %v2456_v36 = vmul.f32 0.02, %v2448_v25  ;;  %vm2452_vm6 = vcmp.gt.f32.partialorder %v2448_v25, 0.0 }
 0x422   : > { %v2517_v39 = vadd.f32 %v2509_v23, %v2458_v35  ;;  %v2459_v3 = vsel %vm2451_vm11, %v2447_v26, %v2455_v30  ;;  %v2457_v46 = vmul.f32 0.02, %v2449_v33  ;;  %vm2453_vm12 = vcmp.gt.f32.partialorder %v2449_v33, 0.0 }
 0x423   : > { %v2518_v56 = vadd.f32 %v2510_v32, %v2459_v3  ;;  %v2460_v40 = vsel %vm2452_vm6, %v2448_v25, %v2456_v36 }
 0x424   : > { %2521 = vst [vmem:[%s220_s27] sm:$0xff] %v2517_v39  ;;  %v2519_v7 = vadd.f32 %v2511_v41, %v2460_v40  ;;  %v2461_v5 = vsel %vm2453_vm12, %v2449_v33, %v2457_v46 }
 0x425   : > { %2522 = vst [vmem:[%s220_s27 + $0x8] sm:$0xff] %v2518_v56  ;;  %v2520_v57 = vadd.f32 %v2512_v38, %v2461_v5 }
 0x426   : > { %2523 = vst [vmem:[%s220_s27 + $0x10] sm:$0xff] %v2519_v7 }
 0x427   : > { %2524 = vst [vmem:[%s220_s27 + $0x18] sm:$0xff] %v2520_v57 }
 0x428   : > { %3384 = shalt.err (!%p3381_p11)
}
 0x429   : > { %s3385_s10 = scalar_lea.hbm %s3815_s23, 512  ;;  %s3389_s29 = scalar_lea.hbm %s3865_s4, 1024 }
 0x42a   : > { %p3386_p13 = scmp.ne.s32.totalorder %s3815_s23, %s3385_s10  ;;  %p3390_p6 = scmp.lt.u32.totalorder %s3815_s23, %s3865_s4 }
 0x42b   : > { %p3391_p9 = scmp.lt.u32.totalorder %s3389_s29, %s3385_s10  ;;  %p3393_p10 = scmp.lt.u32.totalorder %s3385_s10, %s3815_s23 }
 0x42c   : > { %p3387_p5 = pnand %p3386_p13, %p3898_p1 }
 0x42d   : > { %p3392_p12 = por %p3391_p9, %p3390_p6 }
 0x42e   : > { %p3388_p0 = pneg %p3387_p5 }
 0x42f   : > { %p3394_p2 = por %p3393_p10, %p3392_p12 }
 0x431   : > { %p3395_p3 = pnand %p3394_p2, %p3388_p0 }
 0x433   : > { %3398 = shalt.err (!%p3395_p3)
}
 0x434   : > { %s3451_s27 = smov 256  }
 0x435   : > { %2926 = dma.vmem_to_hbm [thread:$0]  (%p3898_p1), %s3810_s30, 512, %s3815_s23, %s3819_s19, %s3451_s27, %s3451_s27, %s3448_s8  }
 0x436 PF: > { %p2943_p4 = scmp.ge.s32.totalorder %s3441_s18, 2  ;;  %s2554_s6 = sand.u32 1, %s3429_s15  }
 0x437   : > { %p3899_p7 = scmp.ne.s32.totalorder %s3872_s26, 0  ;;  %s2555_s20 = scalar_lea.sflag [#allocation5], %s2554_s6 }
 0x439   : > { %p2936_p8 = pnand %p2943_p4, %p3899_p7 }
 0x43b   : > { %3424 = dma.done.wait (!%p2936_p8), %s2555_s20, 512  }
 0x43c   : > { %3426 = vsyncadd (!%p2936_p8), %s2555_s20, 4294966784  ;;  %p16_p11 = scmp.ge.s32.totalorder %s3502_s21, 4   ;;  %s3900_s15 = smov %s3433_s16 }
 0x43d   : > { %s3901_s16 = smov %s3437_s17  ;;  %s3902_s17 = smov %s3513_s24 }
 0x43e   : > { %s3903_s18 = smov %s3502_s21  ;;  %18 = sbr.rel (!%p16_p11) target bundleno = 5 (0x5), region = 87 }
 0x445   :  { %2560 = vsyncpa [#allocation4], 1 }
 0x446   :  { %2562 = vsyncpa [#allocation4 + $0x1], 1 }
 0x447   :  { %2563 = vsyncpa [#allocation7], 1 }
 0x448   :  { %2564 = vsyncpa [#allocation5], 1 }
 0x449   :  { %2566 = vsyncpa [#allocation5 + $0x1], 1 }

</bundles_post_ra>
